<compile_context>
chip_gen: v7x
topology: tpu7x:2x2x1
jax: 0.10.0
libtpu: 0.0.40
codegen_flags: <defaults>
</compile_context>

<pallas_src>
import jax
import jax.numpy as jnp
from jax.experimental import pallas as pl
from jax.experimental.pallas import tpu as pltpu


def residual_add_kernel(x_ref, w_ref, b_ref, o_ref):
    # fn(x) = x @ W + b  (wrapped Linear), residual add fused.
    x = x_ref[...]                                        # (tm, H) bf16 tile
    fx = jnp.dot(x, w_ref[...],                           # bf16 MXU inputs
                 preferred_element_type=jnp.float32)      # f32 accumulation
    fx = fx + b_ref[...]                                  # bias (1, H), f32
    out = fx + x.astype(jnp.float32)                      # residual add in f32
    o_ref[...] = out.astype(o_ref.dtype)                  # store bf16


def residual_add(x_2d, w_bf16, b, *, tm=512):
    """x_2d: (N, H) bf16; w_bf16: (H, H) bf16; b: (1, H) f32. Returns fn(x)+x."""
    N, H = x_2d.shape

    # Shrink the tile for tiny inputs (keep sublane-aligned); no host padding.
    tm = min(tm, pl.cdiv(N, 8) * 8)

    return pl.pallas_call(
        residual_add_kernel,
        out_shape=jax.ShapeDtypeStruct((N, H), x_2d.dtype),
        grid_spec=pltpu.PrefetchScalarGridSpec(
            num_scalar_prefetch=0,
            grid=(pl.cdiv(N, tm),),                        # ragged last tile OK
            in_specs=[
                pl.BlockSpec((tm, H), lambda i: (i, 0)),   # x tile (pipelined)
                pl.BlockSpec((H, H), lambda i: (0, 0)),    # W: VMEM-resident
                pl.BlockSpec((1, H), lambda i: (0, 0)),    # b: VMEM-resident
            ],
            out_specs=pl.BlockSpec((tm, H), lambda i: (i, 0)),
        ),
        compiler_params=pltpu.CompilerParams(
            # Token tiles are independent -> shard across both TCs on v7x.
            dimension_semantics=("parallel",),
            # Default scoped VMEM limit is ample (~1-2 MiB actual footprint).
        ),
    )(x_2d, w_bf16, b)


if __name__ == "__main__":
    # Lane-dense shapes: hidden multiple of 128; enough tokens for >=2 grid
    # steps at tm=512 so both v7x TensorCores get work.
    batch, seq, hidden = 2, 512, 256
    key = jax.random.PRNGKey(0)
    kx, kw, kb = jax.random.split(key, 3)

    # Deterministic inputs / parameters (synthetic; no checkpoint load).
    x = jax.random.normal(kx, (batch, seq, hidden), dtype=jnp.float32)
    w = jax.random.normal(kw, (hidden, hidden), dtype=jnp.float32) * 0.02
    b = jax.random.normal(kb, (1, hidden), dtype=jnp.float32) * 0.02

    # Glue: flatten tokens to a 2-D lane-dense slab; stream x / W in bf16
    # (halves HBM bytes for the mem-bound kernel), bias stays f32.
    x_2d = x.reshape(batch * seq, hidden).astype(jnp.bfloat16)
    w_bf16 = w.astype(jnp.bfloat16)

    out_2d = residual_add(x_2d, w_bf16, b, tm=512)   # grid = (2,)
    out = out_2d.reshape(batch, seq, hidden)
    jax.block_until_ready(out)

    # Reference check: out = fn(x) + x with fn(x) = x @ W + b, computed in f32
    # from the same bf16-cast HBM inputs (tolerance covers f32-accum matmul and
    # the bf16 output rounding).
    xf = x_2d.astype(jnp.float32)
    wf = w_bf16.astype(jnp.float32)
    ref = (xf @ wf + b) + xf
    assert jnp.allclose(out_2d.astype(jnp.float32), ref, atol=3e-2, rtol=3e-2), \
        "mismatch vs reference"

    print("KERNEL_OK")
</pallas_src>

<mosaic_0001>
module attributes {stable_mosaic.version = 11 : i64} {
  func.func @residual_add_kernel(%arg0: i32, %arg1: memref<512x256xbf16, #tpu.memory_space<vmem>>, %arg2: memref<256x256xbf16, #tpu.memory_space<vmem>>, %arg3: memref<1x256xf32, #tpu.memory_space<vmem>>, %arg4: memref<512x256xbf16, #tpu.memory_space<vmem>>) attributes {dimension_semantics = [#tpu.dimension_semantics<parallel>], iteration_bounds = array<i64: 2>, scalar_prefetch = 0 : i64, scratch_operands = 0 : i64, tpu.core_type = #tpu.core_type<tc>, window_params = [{transform_indices = @transform_0, window_bounds = array<i64: 512, 256>}, {pipeline_mode = #tpu.pipeline_mode<synchronous>, transform_indices = @transform_1, window_bounds = array<i64: 256, 256>}, {pipeline_mode = #tpu.pipeline_mode<synchronous>, transform_indices = @transform_2, window_bounds = array<i64: 1, 256>}, {transform_indices = @transform_3, window_bounds = array<i64: 512, 256>}]} {
    %c0 = arith.constant 0 : index
    %c0_0 = arith.constant 0 : index
    %0 = vector.load %arg1[%c0, %c0_0] : memref<512x256xbf16, #tpu.memory_space<vmem>>, vector<512x256xbf16>
    %c0_1 = arith.constant 0 : index
    %c0_2 = arith.constant 0 : index
    %1 = vector.load %arg2[%c0_1, %c0_2] : memref<256x256xbf16, #tpu.memory_space<vmem>>, vector<256x256xbf16>
    %cst = arith.constant dense<0.000000e+00> : vector<512x256xf32>
    %2 = tpu.matmul %0, %1, %cst {dimension_numbers = #tpu.dot_dimension_numbers<[1], [0], [0], [1], [0, 0, 1, 1], [], []>} : vector<512x256xbf16>, vector<256x256xbf16>, vector<512x256xf32> -> vector<512x256xf32>
    %c0_3 = arith.constant 0 : index
    %c0_4 = arith.constant 0 : index
    %3 = vector.load %arg3[%c0_3, %c0_4] : memref<1x256xf32, #tpu.memory_space<vmem>>, vector<1x256xf32>
    %4 = vector.broadcast %3 : vector<1x256xf32> to vector<512x256xf32>
    %5 = arith.addf %2, %4 : vector<512x256xf32>
    %6 = arith.extf %0 : vector<512x256xbf16> to vector<512x256xf32>
    %7 = arith.addf %5, %6 : vector<512x256xf32>
    %8 = arith.truncf %7 : vector<512x256xf32> to vector<512x256xbf16>
    %c0_5 = arith.constant 0 : index
    %c0_6 = arith.constant 0 : index
    %9 = vector.load %arg4[%c0_5, %c0_6] : memref<512x256xbf16, #tpu.memory_space<vmem>>, vector<512x256xbf16>
    tpu.vector_store %arg4[%c0_5, %c0_6], %8 {strides = array<i32>} : memref<512x256xbf16, #tpu.memory_space<vmem>>, vector<512x256xbf16>,
    return
  }
  func.func @transform_0(%arg0: i32) -> (i32, i32) {
    %c0_i32 = arith.constant 0 : i32
    %c0_i32_0 = arith.constant 0 : i32
    return %arg0, %c0_i32 : i32, i32
  }
  func.func @transform_1(%arg0: i32) -> (i32, i32) {
    %c0_i32 = arith.constant 0 : i32
    %c0_i32_0 = arith.constant 0 : i32
    %c0_i32_1 = arith.constant 0 : i32
    return %c0_i32, %c0_i32_0 : i32, i32
  }
  func.func @transform_2(%arg0: i32) -> (i32, i32) {
    %c0_i32 = arith.constant 0 : i32
    %c0_i32_0 = arith.constant 0 : i32
    %c0_i32_1 = arith.constant 0 : i32
    return %c0_i32, %c0_i32_0 : i32, i32
  }
  func.func @transform_3(%arg0: i32) -> (i32, i32) {
    %c0_i32 = arith.constant 0 : i32
    %c0_i32_0 = arith.constant 0 : i32
    return %arg0, %c0_i32 : i32, i32
  }
}

</mosaic_0001>

<bundles_post_ra>
// kernel: tpu_custom_call.1
= control target key start
LH: loop header
LB: loop body
LE: loop exit
PB: predicated region body
PF: predicated region fallthrough
CT: control target
= control target key end

     0   :  { %8 = vsyncpa [#allocation3], 0  ;;  %s3351_s0 = inlined_call_operand.hbm [shape: bf16[1024,256], index: 0, kind: input, shape index: {}]   ;;  %s3352_s1 = inlined_call_operand.hbm [shape: bf16[256,256], index: 1, kind: input, shape index: {}]   ;;  %s3353_s2 = inlined_call_operand.vmem [shape: f32[1,256], index: 2, kind: input, shape index: {}]   ;;  %s3354_s3 = inlined_call_operand.hbm [shape: bf16[1024,256], index: 3, kind: output, shape index: {}]  }
   0x1   :  { %10 = vsyncpa [#allocation3 + $0x1], 0 }
   0x2   :  { %11 = vsyncpa [#allocation6], 0 }
   0x3   :  { %12 = vsyncpa [#allocation4], 0 }
   0x4   :  { %14 = vsyncpa [#allocation4 + $0x1], 0  ;;  %s2578_s12 = smov 0   ;;  %s2580_s13 = smov 0  }
   0x5   :  { %s2582_s14 = smov 0   ;;  %s2584_s15 = smov 0  }
   0x6 LB: > { %s2599_s16 = sadd.s32 4294967295, %s2549_s15   ;;  %s1950_s17 = sadd.s32 4294967294, %s2549_s15   ;;  %s2549_s15 = sphi %s2584_s15, %s3408_s15   ;;  %s2545_s14 = sphi %s2582_s14, %s3407_s14   ;;  %s2541_s13 = sphi %s2580_s13, %s3406_s13   ;;  %s2537_s12 = sphi %s2578_s12, %s3405_s12  }
   0x7   : > { %p40_p0 = scmp.ne.s32.totalorder %s2541_s13, %s2537_s12  ;;  %p3355_p1 = scmp.eq.s32.totalorder %s2599_s16, 0 }
   0x8   : > { %p112_p3 = scmp.eq.s32.totalorder %s1950_s17, 1  ;;  %p1951_p5 = scmp.ge.s32.totalorder %s2549_s15, 1 }
   0x9   : > { %p2608_p4 = por %p3355_p1, %p40_p0  ;;  %p119_p7 = scmp.lt.s32.totalorder %s2549_s15, 3 }
   0xa   : > { %p2613_p6 = por %p112_p3, %p40_p0  ;;  %s2551_s21 = smov [#allocation5]  }
   0xb   : > { %s3374_s18 = scalar_select %p2608_p4, 1, 0 }
   0xc   : > { %s3375_s19 = scalar_select %p2613_p6, 1, 0 }
   0xd   : > { %p2618_p8 = pnand %p1951_p5, %p119_p7  ;;  %s131_s22 = sshll.u32 %s2551_s21, 4  ;;  %s2622_s22 = int_to_ptr.vmem [resolvable:$true] %s131_s22 }
   0xe   : > { %s2634_s24 = sadd.s32 1, %s2549_s15   ;;  %s27_s25 = sadd.s32 1, %s2545_s14 }
   0xf   : > { %s3376_s20 = scalar_select %p2618_p8, 1, 0 }
  0x10   : > { %p2236_p9 = pneg %p2618_p8  ;;  %s24_s26 = ssub.s32 %s2549_s15, %s2634_s24 }
  0x11   : > { %s2421_s29 = scalar_lea.hbm %s3352_s1, 4096 }
  0x12   : > { %p2629_p11 = pnand %p2236_p9, %p3355_p1  ;;  %p2422_p12 = scmp.ne.s32.totalorder %s3352_s1, %s2421_s29 }
  0x13   : > { %p2428_p5 = scmp.lt.u32.totalorder %s2421_s29, %s3352_s1 }
  0x14   : > { %p2423_p13 = pneg %p2629_p11 }
  0x16   : > { %p2424_p0 = pnand %p2423_p13, %p2422_p12 }
  0x18   : > { %p2425_p3 = pneg %p2424_p0 }
  0x1a   : > { %p2430_p7 = pnand %p2428_p5, %p2425_p3 }
  0x1c   : > { %2433 = shalt.err (!%p2430_p7)
}
  0x1d   : > { %s2434_s7 = scalar_lea.vmem %s2622_s22, 4096  ;;  %p2442_p2 = scmp.lt.s32.totalorder %s2622_s22, %s2622_s22 }
  0x1e   : > { %p2435_p9 = scmp.ne.s32.totalorder %s2622_s22, %s2434_s7  ;;  %p2443_p6 = scmp.lt.s32.totalorder %s2434_s7, %s2434_s7 }
  0x20   : > { %p2437_p10 = pnand %p2435_p9, %p2423_p13  ;;  %p2444_p4 = por %p2443_p6, %p2442_p2 }
  0x22   : > { %p2438_p1 = pneg %p2437_p10 }
  0x24   : > { %p2445_p8 = pnand %p2444_p4, %p2438_p1 }
  0x26   : > { %2448 = shalt.err (!%p2445_p8)
}
  0x27   : > { %s2552_s8 = smov 128   ;;  %s2553_s9 = smov 8  }
  0x28   : > { %2239 = dma.hbm_to_vmem [thread:$0]  (!%p2629_p11), %s3352_s1, 4096, %s2622_s22, [#allocation6], %s2552_s8, %s2552_s8, %s2553_s9  }
  0x29   : > { %p25_p1 = scmp.eq.s32.totalorder %s24_s26, 0  ;;  %p34_p2 = scmp.ne.s32.totalorder %s2545_s14, %s2541_s13 }
  0x2a   : > { %p35_p4 = scmp.eq.s32.totalorder %s2549_s15, 0  ;;  %p2249_p6 = scmp.lt.s32.totalorder %s2549_s15, 2 }
  0x2b   : > { %s2668_s17 = scalar_select %p25_p1, %s2545_s14, %s27_s25  }
  0x2c   : > { %p36_p8 = por %p35_p4, %p34_p2  ;;  %p3378_p10 = scmp.eq.s32.totalorder %s2599_s16, 1 }
  0x2d   : > { %s148_s23 = sand.u32 1, %s2545_s14   ;;  %s2129_s27 = sshll.u32 %s2549_s15, 13 }
  0x2e   : > { %p2672_p12 = por %p3378_p10, %p34_p2  ;;  %s1954_s28 = sshll.u32 %s148_s23, 9 }
  0x2f   : > { %s2681_s4 = scalar_lea.hbm %s3351_s0, %s2129_s27  ;;  %s152_s22 = scalar_lea.vmem [#allocation2], %s1954_s28 }
  0x30   : > { %s160_s25 = sshll.u32 %s152_s22, 4  ;;  %p2683_p11 = pnand %p2249_p6, %p36_p8  ;;  %s2687_s25 = int_to_ptr.vmem [resolvable:$true] %s160_s25 }
  0x31   : > { %s2689_s5 = scalar_lea.sflag [#allocation3], %s148_s23  ;;  %s2449_s6 = scalar_lea.hbm %s2681_s4, 8192 }
  0x32   : > { %p2450_p13 = scmp.ne.s32.totalorder %s2681_s4, %s2449_s6  ;;  %p2451_p0 = pneg %p2683_p11 }
  0x33   : > { %s2454_s11 = scalar_lea.hbm %s3351_s0, 16384  ;;  %p2455_p7 = scmp.lt.u32.totalorder %s2681_s4, %s3351_s0 }
  0x34   : > { %p2452_p3 = pnand %p2451_p0, %p2450_p13  ;;  %p2456_p9 = scmp.lt.u32.totalorder %s2454_s11, %s2449_s6 }
  0x35   : > { %p2458_p2 = scmp.lt.u32.totalorder %s2449_s6, %s2681_s4 }
  0x36   : > { %p2453_p5 = pneg %p2452_p3  ;;  %p2457_p1 = por %p2456_p9, %p2455_p7 }
  0x38   : > { %p2459_p4 = por %p2458_p2, %p2457_p1 }
  0x3a   : > { %p2460_p6 = pnand %p2459_p4, %p2453_p5 }
  0x3c   : > { %2463 = shalt.err (!%p2460_p6)
}
  0x3d   : > { %s2464_s23 = scalar_lea.vmem %s2687_s25, 8192  ;;  %s2554_s29 = smov [#allocation2]  }
  0x3e   : > { %p2465_p8 = scmp.ne.s32.totalorder %s2687_s25, %s2464_s23  ;;  %s2469_s30 = sshll.u32 %s2554_s29, 4  ;;  %s2470_s30 = int_to_ptr.vmem [resolvable:$false] %s2469_s30 }
  0x3f   : > { %s2471_s22 = scalar_lea.vmem %s2470_s30, 16384  ;;  %p2472_p3 = scmp.lt.s32.totalorder %s2687_s25, %s2470_s30 }
  0x40   : > { %p2467_p10 = pnand %p2465_p8, %p2451_p0  ;;  %p2473_p7 = scmp.lt.s32.totalorder %s2471_s22, %s2464_s23 }
  0x42   : > { %p2468_p13 = pneg %p2467_p10  ;;  %p2474_p9 = por %p2473_p7, %p2472_p3 }
  0x44   : > { %p2475_p1 = pnand %p2474_p9, %p2468_p13 }
  0x46   : > { %2478 = shalt.err (!%p2475_p1)
}
  0x47   : > { %2243 = dma.hbm_to_vmem [thread:$0]  (!%p2683_p11), %s2681_s4, 8192, %s2687_s25, %s2689_s5, %s2552_s8, %s2552_s8, %s2553_s9  }
  0x48   : > { %p3381_p0 = scmp.ne.s32.totalorder %s3376_s20, 0 }
  0x4a   : > { %172 = sbr.rel (%p3381_p0) target bundleno = 509 (0x1fd), region = 32 }
  0x51   : > { %s2723_s6 = sand.u32 1, %s2541_s13   ;;  %p3382_p5 = scmp.ne.s32.totalorder %s3374_s18, 0 }
  0x52   : > { %s1959_s7 = sshll.u32 %s2723_s6, 9  ;;  %s175_s10 = scalar_lea.sflag [#allocation3], %s2723_s6 }
  0x53   : > { %s2729_s26 = scalar_lea.vmem [#allocation2], %s1959_s7 }
  0x54   : > { %2524 = dma.done.wait (%p3382_p5), %s175_s10, 8192  }
  0x55   : > { %2526 = vsyncadd (%p3382_p5), %s175_s10, 4294959104  ;;  %p3383_p11 = scmp.eq.s32.totalorder %s2599_s16, 0 }
  0x57   : > { %2528 = dma.done.wait (%p3383_p11), [#allocation6], 4096   ;;  %p3384_p2 = pmov %p3383_p11 }
  0x58   : > { %v2289_v0 = vld [vmem:[#allocation5 + $0x4] ss:$8 sps:$4 sm:$0xff]   ;;  %v2291_v1 = vld [vmem:[#allocation5] ss:$8 sps:$4 sm:$0xff]   ;;  %v2292_v2 = vld [vmem:[#allocation5 + $0x14] ss:$8 sps:$4 sm:$0xff]  }
  0x59   : > { %2530 = vsyncadd (%p3384_p2), [#allocation6], 4294963200  ;;  %795 = vmatprep.subr.bf16.mxu0 %v2289_v0  ;;  %2196 = vmatprep.subr.bf16.mxu1 %v2289_v0  ;;  %v2294_v3 = vld [vmem:[#allocation5 + $0x10] ss:$8 sps:$4 sm:$0xff]   ;;  %v2295_v4 = vld [vmem:[#allocation5 + $0x24] ss:$8 sps:$4 sm:$0xff]  }
  0x5a   : > { %796 = vmatpush1.bf16.msra.mxu0 %v2291_v1  ;;  %2212 = vmatpush1.bf16.msra.mxu1 %v2291_v1  ;;  %v2297_v5 = vld [vmem:[#allocation5 + $0x20] ss:$8 sps:$4 sm:$0xff]   ;;  %v2298_v6 = vld [vmem:[#allocation5 + $0x34] ss:$8 sps:$4 sm:$0xff]   ;;  %v2300_v7 = vld [vmem:[#allocation5 + $0x30] ss:$8 sps:$4 sm:$0xff]  }
  0x5b   : > { %797 = vmatprep.subr.bf16.mxu0 %v2292_v2  ;;  %2197 = vmatprep.subr.bf16.mxu1 %v2292_v2  ;;  %v2301_v8 = vld [vmem:[#allocation5 + $0x44] ss:$8 sps:$4 sm:$0xff]   ;;  %v2303_v9 = vld [vmem:[#allocation5 + $0x40] ss:$8 sps:$4 sm:$0xff]   ;;  %v2304_v10 = vld [vmem:[#allocation5 + $0x54] ss:$8 sps:$4 sm:$0xff]  }
  0x5c   : > { %v2306_v11 = vld [vmem:[#allocation5 + $0x50] ss:$8 sps:$4 sm:$0xff]   ;;  %v2307_v12 = vld [vmem:[#allocation5 + $0x64] ss:$8 sps:$4 sm:$0xff]   ;;  %v2309_v18 = vld [vmem:[#allocation5 + $0x60] ss:$8 sps:$4 sm:$0xff]  }
  0x5d   : > { %v2740_v13 = vld [vmem:[%s2729_s26] sm:$0xff]  ;;  %v2743_v14 = vld [vmem:[%s2729_s26 + $0x8] sm:$0xff]  ;;  %v2310_v20 = vld [vmem:[#allocation5 + $0x74] ss:$8 sps:$4 sm:$0xff]   ;;  %s3014_s8 = scalar_lea.vmem [#allocation7], %s1959_s7  ;;  %s2195_s9 = sshll.u32 %s2599_s16, 13 }
  0x5e   : > { %798 = vmatpush1.bf16.msra.mxu0 %v2294_v3  ;;  %2213 = vmatpush1.bf16.msra.mxu1 %v2294_v3  ;;  %v1963_v15 = vcombine.high %v2740_v13, %v2743_v14  ;;  %v2748_v16 = vld [vmem:[%s2729_s26 + $0x100] sm:$0xff]  ;;  %v2751_v17 = vld [vmem:[%s2729_s26 + $0x108] sm:$0xff]  ;;  %v2312_v21 = vld [vmem:[#allocation5 + $0x70] ss:$8 sps:$4 sm:$0xff]   ;;  %v1962_v42 = vcombine.low %v2740_v13, %v2743_v14  ;;  %s1867_s4 = sshll.u32 %s3014_s8, 4  ;;  %s3301_s11 = scalar_lea.hbm %s3354_s3, %s2195_s9  ;;  %s3303_s4 = int_to_ptr.vmem [resolvable:$true] %s1867_s4 }
  0x5f   : > { %799 = vmatprep.subr.bf16.mxu0 %v2295_v4  ;;  %2198 = vmatprep.subr.bf16.mxu1 %v2295_v4  ;;  %v1995_v19 = vcombine.high %v2748_v16, %v2751_v17  ;;  %v2313_v22 = vld [vmem:[#allocation5 + $0x84] ss:$8 sps:$4 sm:$0xff]   ;;  %v2315_v23 = vld [vmem:[#allocation5 + $0x80] ss:$8 sps:$4 sm:$0xff]   ;;  %v2316_v24 = vld [vmem:[#allocation5 + $0x94] ss:$8 sps:$4 sm:$0xff]   ;;  %v1994_v43 = vcombine.low %v2748_v16, %v2751_v17 }
  0x60   : > { %827 = vmatprep.mubr.bf16.mxu0 %v1963_v15  ;;  %v2318_v25 = vld [vmem:[#allocation5 + $0x90] ss:$8 sps:$4 sm:$0xff]   ;;  %v2319_v26 = vld [vmem:[#allocation5 + $0xa4] ss:$8 sps:$4 sm:$0xff]   ;;  %v2321_v27 = vld [vmem:[#allocation5 + $0xa0] ss:$8 sps:$4 sm:$0xff]  }
  0x61   : > { %987 = vmatprep.mubr.bf16.mxu1 %v1995_v19  ;;  %v2322_v28 = vld [vmem:[#allocation5 + $0xb4] ss:$8 sps:$4 sm:$0xff]   ;;  %v2324_v29 = vld [vmem:[#allocation5 + $0xb0] ss:$8 sps:$4 sm:$0xff]   ;;  %v2325_v30 = vld [vmem:[#allocation5 + $0xc4] ss:$8 sps:$4 sm:$0xff]  }
  0x62   : > { %800 = vmatpush1.bf16.msra.mxu0 %v2297_v5  ;;  %2214 = vmatpush1.bf16.msra.mxu1 %v2297_v5  ;;  %v2327_v31 = vld [vmem:[#allocation5 + $0xc0] ss:$8 sps:$4 sm:$0xff]   ;;  %v2328_v32 = vld [vmem:[#allocation5 + $0xd4] ss:$8 sps:$4 sm:$0xff]   ;;  %v2330_v33 = vld [vmem:[#allocation5 + $0xd0] ss:$8 sps:$4 sm:$0xff]  }
  0x63   : > { %801 = vmatprep.subr.bf16.mxu0 %v2298_v6  ;;  %2199 = vmatprep.subr.bf16.mxu1 %v2298_v6  ;;  %v2331_v34 = vld [vmem:[#allocation5 + $0xe4] ss:$8 sps:$4 sm:$0xff]   ;;  %v2333_v35 = vld [vmem:[#allocation5 + $0xe0] ss:$8 sps:$4 sm:$0xff]   ;;  %v2334_v36 = vld [vmem:[#allocation5 + $0xf4] ss:$8 sps:$4 sm:$0xff]  }
  0x64   : > { %v2336_v37 = vld [vmem:[#allocation5 + $0xf0] ss:$8 sps:$4 sm:$0xff]   ;;  %v2776_v46 = vld [vmem:[%s2729_s26 + $0x20] sm:$0xff]  ;;  %v2779_v47 = vld [vmem:[%s2729_s26 + $0x28] sm:$0xff]  ;;  %s1853_s16 = scalar_lea.sflag [#allocation4], %s2723_s6  ;;  %s2479_s27 = scalar_lea.vmem %s3303_s4, 8192 }
  0x65   : > { %v2756_v38 = vld [vmem:[%s2729_s26 + $0x10] sm:$0xff]  ;;  %v2759_v39 = vld [vmem:[%s2729_s26 + $0x18] sm:$0xff]  ;;  %v2782_v48 = vld [vmem:[%s2729_s26 + $0x120] sm:$0xff]  ;;  %v1967_v52 = vcombine.high %v2776_v46, %v2779_v47  ;;  %v1966_v58 = vcombine.low %v2776_v46, %v2779_v47  ;;  %p2480_p4 = scmp.ne.s32.totalorder %s3303_s4, %s2479_s27  ;;  %s2555_s28 = smov [#allocation7]  }
  0x66   : > { %802 = vmatpush1.bf16.msra.mxu0 %v2300_v7  ;;  %2215 = vmatpush1.bf16.msra.mxu1 %v2300_v7  ;;  %v2762_v40 = vld [vmem:[%s2729_s26 + $0x110] sm:$0xff]  ;;  %v2765_v41 = vld [vmem:[%s2729_s26 + $0x118] sm:$0xff]  ;;  %v1965_v44 = vcombine.high %v2756_v38, %v2759_v39  ;;  %v2785_v49 = vld [vmem:[%s2729_s26 + $0x128] sm:$0xff]  ;;  %v1964_v50 = vcombine.low %v2756_v38, %v2759_v39  ;;  %s2483_s23 = sshll.u32 %s2555_s28, 4  ;;  %s2484_s23 = int_to_ptr.vmem [resolvable:$false] %s2483_s23 }
  0x67   : > { %803 = vmatprep.subr.bf16.mxu0 %v2301_v8  ;;  %2200 = vmatprep.subr.bf16.mxu1 %v2301_v8  ;;  %v1997_v45 = vcombine.high %v2762_v40, %v2765_v41  ;;  %v1996_v51 = vcombine.low %v2762_v40, %v2765_v41  ;;  %v1999_v53 = vcombine.high %v2782_v48, %v2785_v49  ;;  %v2796_v54 = vld [vmem:[%s2729_s26 + $0x30] sm:$0xff]  ;;  %v2799_v55 = vld [vmem:[%s2729_s26 + $0x38] sm:$0xff]  ;;  %v2816_v62 = vld [vmem:[%s2729_s26 + $0x40] sm:$0xff]  ;;  %p2481_p6 = pnand %p2480_p4, %p2672_p12  ;;  %s2485_s29 = scalar_lea.vmem %s2484_s23, 16384 }
  0x68   : > { %v2802_v56 = vld [vmem:[%s2729_s26 + $0x130] sm:$0xff]  ;;  %v2805_v57 = vld [vmem:[%s2729_s26 + $0x138] sm:$0xff]  ;;  %v1998_v59 = vcombine.low %v2782_v48, %v2785_v49  ;;  %v1969_v60 = vcombine.high %v2796_v54, %v2799_v55  ;;  %v2819_v63 = vld [vmem:[%s2729_s26 + $0x48] sm:$0xff]  ;;  %v1968_v2 = vcombine.low %v2796_v54, %v2799_v55  ;;  %p2486_p10 = scmp.lt.s32.totalorder %s3303_s4, %s2484_s23  ;;  %p2487_p13 = scmp.lt.s32.totalorder %s2485_s29, %s2479_s27 }
  0x69   : > { %v2001_v61 = vcombine.high %v2802_v56, %v2805_v57  ;;  %v2822_v0 = vld [vmem:[%s2729_s26 + $0x140] sm:$0xff]  ;;  %v2825_v1 = vld [vmem:[%s2729_s26 + $0x148] sm:$0xff]  ;;  %v2000_v3 = vcombine.low %v2802_v56, %v2805_v57  ;;  %v1971_v4 = vcombine.high %v2816_v62, %v2819_v63  ;;  %v2836_v6 = vld [vmem:[%s2729_s26 + $0x50] sm:$0xff]  ;;  %p2482_p8 = pneg %p2481_p6 }
  0x6a   : > { %804 = vmatpush1.bf16.msra.mxu0 %v2303_v9  ;;  %2216 = vmatpush1.bf16.msra.mxu1 %v2303_v9  ;;  %v2003_v5 = vcombine.high %v2822_v0, %v2825_v1  ;;  %v2839_v7 = vld [vmem:[%s2729_s26 + $0x58] sm:$0xff]  ;;  %v2842_v8 = vld [vmem:[%s2729_s26 + $0x150] sm:$0xff]  ;;  %v2859_v19 = vld [vmem:[%s2729_s26 + $0x68] sm:$0xff]  ;;  %p2488_p3 = por %p2487_p13, %p2486_p10 }
  0x6b   : > { %805 = vmatprep.subr.bf16.mxu0 %v2304_v10  ;;  %2201 = vmatprep.subr.bf16.mxu1 %v2304_v10  ;;  %v2845_v9 = vld [vmem:[%s2729_s26 + $0x158] sm:$0xff]  ;;  %v1970_v10 = vcombine.low %v2816_v62, %v2819_v63 }
  0x6c   : > { %v2005_v15 = vcombine.high %v2842_v8, %v2845_v9  ;;  %p2489_p7 = pnand %p2488_p3, %p2482_p8 }
  0x6e   : > { %806 = vmatpush1.bf16.msra.mxu0 %v2306_v11  ;;  %2217 = vmatpush1.bf16.msra.mxu1 %v2306_v11  ;;  %v2002_v11 = vcombine.low %v2822_v0, %v2825_v1 }
  0x6f   : > { %807 = vmatprep.subr.bf16.mxu0 %v2307_v12  ;;  %2202 = vmatprep.subr.bf16.mxu1 %v2307_v12  ;;  %v1973_v12 = vcombine.high %v2836_v6, %v2839_v7 }
  0x72   : > { %808 = vmatpush1.bf16.msra.mxu0 %v2309_v18  ;;  %2218 = vmatpush1.bf16.msra.mxu1 %v2309_v18  ;;  %v2856_v18 = vld [vmem:[%s2729_s26 + $0x60] sm:$0xff] }
  0x73   : > { %809 = vmatprep.subr.bf16.mxu0 %v2310_v20  ;;  %2203 = vmatprep.subr.bf16.mxu1 %v2310_v20  ;;  %v2862_v20 = vld [vmem:[%s2729_s26 + $0x160] sm:$0xff] }
  0x76   : > { %810 = vmatpush1.bf16.msra.mxu0 %v2312_v21  ;;  %2219 = vmatpush1.bf16.msra.mxu1 %v2312_v21  ;;  %v2865_v21 = vld [vmem:[%s2729_s26 + $0x168] sm:$0xff] }
  0x77   : > { %811 = vmatprep.subr.bf16.mxu0 %v2313_v22  ;;  %2204 = vmatprep.subr.bf16.mxu1 %v2313_v22  ;;  %v1972_v22 = vcombine.low %v2836_v6, %v2839_v7 }
  0x7a   : > { %812 = vmatpush1.bf16.msra.mxu0 %v2315_v23  ;;  %2220 = vmatpush1.bf16.msra.mxu1 %v2315_v23  ;;  %v2004_v23 = vcombine.low %v2842_v8, %v2845_v9 }
  0x7b   : > { %813 = vmatprep.subr.bf16.mxu0 %v2316_v24  ;;  %2205 = vmatprep.subr.bf16.mxu1 %v2316_v24  ;;  %v1975_v24 = vcombine.high %v2856_v18, %v2859_v19 }
  0x7e   : > { %814 = vmatpush1.bf16.msra.mxu0 %v2318_v25  ;;  %2221 = vmatpush1.bf16.msra.mxu1 %v2318_v25  ;;  %v2007_v25 = vcombine.high %v2862_v20, %v2865_v21 }
  0x7f   : > { %815 = vmatprep.subr.bf16.mxu0 %v2319_v26  ;;  %2206 = vmatprep.subr.bf16.mxu1 %v2319_v26  ;;  %v2876_v26 = vld [vmem:[%s2729_s26 + $0x70] sm:$0xff] }
  0x82   : > { %816 = vmatpush1.bf16.msra.mxu0 %v2321_v27  ;;  %2222 = vmatpush1.bf16.msra.mxu1 %v2321_v27  ;;  %v2879_v27 = vld [vmem:[%s2729_s26 + $0x78] sm:$0xff] }
  0x83   : > { %817 = vmatprep.subr.bf16.mxu0 %v2322_v28  ;;  %2207 = vmatprep.subr.bf16.mxu1 %v2322_v28  ;;  %v2882_v28 = vld [vmem:[%s2729_s26 + $0x170] sm:$0xff] }
  0x86   : > { %818 = vmatpush1.bf16.msra.mxu0 %v2324_v29  ;;  %2223 = vmatpush1.bf16.msra.mxu1 %v2324_v29  ;;  %v2885_v29 = vld [vmem:[%s2729_s26 + $0x178] sm:$0xff] }
  0x87   : > { %819 = vmatprep.subr.bf16.mxu0 %v2325_v30  ;;  %2208 = vmatprep.subr.bf16.mxu1 %v2325_v30  ;;  %v1974_v30 = vcombine.low %v2856_v18, %v2859_v19 }
  0x8a   : > { %820 = vmatpush1.bf16.msra.mxu0 %v2327_v31  ;;  %2224 = vmatpush1.bf16.msra.mxu1 %v2327_v31  ;;  %v2006_v31 = vcombine.low %v2862_v20, %v2865_v21 }
  0x8b   : > { %821 = vmatprep.subr.bf16.mxu0 %v2328_v32  ;;  %2209 = vmatprep.subr.bf16.mxu1 %v2328_v32  ;;  %v1977_v32 = vcombine.high %v2876_v26, %v2879_v27 }
  0x8e   : > { %822 = vmatpush1.bf16.msra.mxu0 %v2330_v33  ;;  %2225 = vmatpush1.bf16.msra.mxu1 %v2330_v33  ;;  %v2009_v33 = vcombine.high %v2882_v28, %v2885_v29 }
  0x8f   : > { %823 = vmatprep.subr.bf16.mxu0 %v2331_v34  ;;  %2210 = vmatprep.subr.bf16.mxu1 %v2331_v34  ;;  %v2896_v34 = vld [vmem:[%s2729_s26 + $0x80] sm:$0xff] }
  0x92   : > { %824 = vmatpush1.bf16.msra.mxu0 %v2333_v35  ;;  %2226 = vmatpush1.bf16.msra.mxu1 %v2333_v35  ;;  %v2899_v35 = vld [vmem:[%s2729_s26 + $0x88] sm:$0xff] }
  0x93   : > { %825 = vmatprep.subr.bf16.mxu0 %v2334_v36  ;;  %2211 = vmatprep.subr.bf16.mxu1 %v2334_v36  ;;  %v2902_v36 = vld [vmem:[%s2729_s26 + $0x180] sm:$0xff] }
  0x96   : > { %826 = vmatpush1.bf16.msra.mxu0 %v2336_v37  ;;  %2227 = vmatpush1.bf16.msra.mxu1 %v2336_v37  ;;  %v2905_v37 = vld [vmem:[%s2729_s26 + $0x188] sm:$0xff] }
  0x99   : > { %828 = vmatmul.mubr.bf16.vlgmr.msra.gmra.mrb[0].mxu0 %v1962_v42  ;;  %988 = vmatmul.mubr.bf16.vlgmr.msra.gmra.mrb[0].mxu1 %v1994_v43  ;;  %v1976_v42 = vcombine.low %v2876_v26, %v2879_v27  ;;  %v2008_v43 = vcombine.low %v2882_v28, %v2885_v29 }
  0x9a   : > { %837 = vmatprep.mubr.bf16.mxu0 %v1965_v44  ;;  %997 = vmatprep.mubr.bf16.mxu1 %v1997_v45  ;;  %v1979_v44 = vcombine.high %v2896_v34, %v2899_v35  ;;  %v2011_v45 = vcombine.high %v2902_v36, %v2905_v37 }
  0xa1   : > { %838 = vmatmul.mubr.bf16.gmra.mrb[4].mxu0 %v1964_v50  ;;  %998 = vmatmul.mubr.bf16.gmra.mrb[4].mxu1 %v1996_v51  ;;  %v2916_v50 = vld [vmem:[%s2729_s26 + $0x90] sm:$0xff]  ;;  %v2919_v51 = vld [vmem:[%s2729_s26 + $0x98] sm:$0xff] }
  0xa2   : > { %847 = vmatprep.mubr.bf16.mxu0 %v1967_v52  ;;  %1007 = vmatprep.mubr.bf16.mxu1 %v1999_v53  ;;  %3385 = vst [vmem:[#allocation11_spill] sm:$0xff] %v2919_v51  ;;  %v2922_v52 = vld [vmem:[%s2729_s26 + $0x190] sm:$0xff]  ;;  %v2925_v53 = vld [vmem:[%s2729_s26 + $0x198] sm:$0xff] }
  0xa3   : > { %3386 = vst [vmem:[#allocation12_spill] sm:$0xff] %v2922_v52  ;;  %3387 = vst [vmem:[#allocation13_spill] sm:$0xff] %v2925_v53 }
  0xa9   : > { %848 = vmatmul.mubr.bf16.gmra.mrb[8].mxu0 %v1966_v58  ;;  %1008 = vmatmul.mubr.bf16.gmra.mrb[8].mxu1 %v1998_v59  ;;  %v1978_v58 = vcombine.low %v2896_v34, %v2899_v35  ;;  %v2010_v59 = vcombine.low %v2902_v36, %v2905_v37 }
  0xaa   : > { %857 = vmatprep.mubr.bf16.mxu0 %v1969_v60  ;;  %1017 = vmatprep.mubr.bf16.mxu1 %v2001_v61  ;;  %v1981_v60 = vcombine.high %v2916_v50, %v2919_v51  ;;  %v2013_v61 = vcombine.high %v2922_v52, %v2925_v53 }
  0xb1   : > { %858 = vmatmul.mubr.bf16.gmra.mrb[12].mxu0 %v1968_v2  ;;  %1018 = vmatmul.mubr.bf16.gmra.mrb[12].mxu1 %v2000_v3  ;;  %v2936_v2 = vld [vmem:[%s2729_s26 + $0xa0] sm:$0xff]  ;;  %v2939_v3 = vld [vmem:[%s2729_s26 + $0xa8] sm:$0xff] }
  0xb2   : > { %867 = vmatprep.mubr.bf16.mxu0 %v1971_v4  ;;  %1027 = vmatprep.mubr.bf16.mxu1 %v2003_v5  ;;  %3388 = vst [vmem:[#allocation14_spill] sm:$0xff] %v2936_v2  ;;  %3389 = vst [vmem:[#allocation15_spill] sm:$0xff] %v2939_v3  ;;  %v2942_v4 = vld [vmem:[%s2729_s26 + $0x1a0] sm:$0xff]  ;;  %v2945_v5 = vld [vmem:[%s2729_s26 + $0x1a8] sm:$0xff] }
  0xb3   : > { %3390 = vst [vmem:[#allocation16_spill] sm:$0xff] %v2942_v4  ;;  %3391 = vst [vmem:[#allocation17_spill] sm:$0xff] %v2945_v5 }
  0xb9   : > { %868 = vmatmul.mubr.bf16.gmra.mrb[16].mxu0 %v1970_v10  ;;  %1028 = vmatmul.mubr.bf16.gmra.mrb[16].mxu1 %v2002_v11  ;;  %v1980_v10 = vcombine.low %v2916_v50, %v2919_v51  ;;  %v2012_v11 = vcombine.low %v2922_v52, %v2925_v53 }
  0xba   : > { %877 = vmatprep.mubr.bf16.mxu0 %v1973_v12  ;;  %1037 = vmatprep.mubr.bf16.mxu1 %v2005_v15  ;;  %v1983_v12 = vcombine.high %v2936_v2, %v2939_v3  ;;  %v2015_v15 = vcombine.high %v2942_v4, %v2945_v5 }
  0xc1   : > { %878 = vmatmul.mubr.bf16.gmra.mrb[20].mxu0 %v1972_v22  ;;  %1038 = vmatmul.mubr.bf16.gmra.mrb[20].mxu1 %v2004_v23  ;;  %v2956_v22 = vld [vmem:[%s2729_s26 + $0xb0] sm:$0xff]  ;;  %v230_v23 = vld [vmem:[%s2729_s26 + $0xb8] sm:$0xff] }
  0xc2   : > { %887 = vmatprep.mubr.bf16.mxu0 %v1975_v24  ;;  %1047 = vmatprep.mubr.bf16.mxu1 %v2007_v25  ;;  %3392 = vst [vmem:[#allocation18_spill] sm:$0xff] %v2956_v22  ;;  %v2960_v24 = vld [vmem:[%s2729_s26 + $0x1b0] sm:$0xff]  ;;  %v262_v25 = vld [vmem:[%s2729_s26 + $0x1b8] sm:$0xff] }
  0xc3   : > { %3393 = vst [vmem:[#allocation19_spill] sm:$0xff] %v2960_v24 }
  0xc9   : > { %888 = vmatmul.mubr.bf16.gmra.mrb[24].mxu0 %v1974_v30  ;;  %1048 = vmatmul.mubr.bf16.gmra.mrb[24].mxu1 %v2006_v31  ;;  %v1982_v30 = vcombine.low %v2936_v2, %v2939_v3  ;;  %v2014_v31 = vcombine.low %v2942_v4, %v2945_v5 }
  0xca   : > { %897 = vmatprep.mubr.bf16.mxu0 %v1977_v32  ;;  %1057 = vmatprep.mubr.bf16.mxu1 %v2009_v33  ;;  %v1985_v32 = vcombine.high %v2956_v22, %v230_v23  ;;  %v2017_v33 = vcombine.high %v2960_v24, %v262_v25 }
  0xd1   : > { %898 = vmatmul.mubr.bf16.gmra.mrb[28].mxu0 %v1976_v42  ;;  %1058 = vmatmul.mubr.bf16.gmra.mrb[28].mxu1 %v2008_v43  ;;  %v231_v42 = vld [vmem:[%s2729_s26 + $0xc0] sm:$0xff]  ;;  %v232_v43 = vld [vmem:[%s2729_s26 + $0xc8] sm:$0xff] }
  0xd2   : > { %907 = vmatprep.mubr.bf16.mxu0 %v1979_v44  ;;  %1067 = vmatprep.mubr.bf16.mxu1 %v2011_v45  ;;  %v263_v44 = vld [vmem:[%s2729_s26 + $0x1c0] sm:$0xff]  ;;  %v264_v45 = vld [vmem:[%s2729_s26 + $0x1c8] sm:$0xff] }
  0xd9   : > { %908 = vmatmul.mubr.bf16.gmra.mrb[32].mxu0 %v1978_v58  ;;  %1068 = vmatmul.mubr.bf16.gmra.mrb[32].mxu1 %v2010_v59  ;;  %v1984_v58 = vcombine.low %v2956_v22, %v230_v23  ;;  %v2016_v59 = vcombine.low %v2960_v24, %v262_v25  ;;  %v235_v25 = vld [vmem:[%s2729_s26 + $0xe0] sm:$0xff] }
  0xda   : > { %917 = vmatprep.mubr.bf16.mxu0 %v1981_v60  ;;  %1077 = vmatprep.mubr.bf16.mxu1 %v2013_v61  ;;  %v1987_v60 = vcombine.high %v231_v42, %v232_v43  ;;  %v2019_v61 = vcombine.high %v263_v44, %v264_v45 }
  0xe1   : > { %918 = vmatmul.mubr.bf16.gmra.mrb[36].mxu0 %v1980_v10  ;;  %1078 = vmatmul.mubr.bf16.gmra.mrb[36].mxu1 %v2012_v11  ;;  %v233_v10 = vld [vmem:[%s2729_s26 + $0xd0] sm:$0xff]  ;;  %v234_v11 = vld [vmem:[%s2729_s26 + $0xd8] sm:$0xff] }
  0xe2   : > { %927 = vmatprep.mubr.bf16.mxu0 %v1983_v12  ;;  %1087 = vmatprep.mubr.bf16.mxu1 %v2015_v15  ;;  %v265_v12 = vld [vmem:[%s2729_s26 + $0x1d0] sm:$0xff]  ;;  %v266_v15 = vld [vmem:[%s2729_s26 + $0x1d8] sm:$0xff] }
  0xe3   : > { %v2021_v23 = vcombine.high %v265_v12, %v266_v15 }
  0xe9   : > { %928 = vmatmul.mubr.bf16.gmra.mrb[40].mxu0 %v1982_v30  ;;  %1088 = vmatmul.mubr.bf16.gmra.mrb[40].mxu1 %v2014_v31  ;;  %v1986_v30 = vcombine.low %v231_v42, %v232_v43  ;;  %v2018_v31 = vcombine.low %v263_v44, %v264_v45  ;;  %v237_v42 = vld [vmem:[%s2729_s26 + $0xf0] sm:$0xff]  ;;  %v238_v43 = vld [vmem:[%s2729_s26 + $0xf8] sm:$0xff] }
  0xea   : > { %937 = vmatprep.mubr.bf16.mxu0 %v1985_v32  ;;  %1097 = vmatprep.mubr.bf16.mxu1 %v2017_v33  ;;  %v1989_v32 = vcombine.high %v233_v10, %v234_v11  ;;  %v236_v33 = vld [vmem:[%s2729_s26 + $0xe8] sm:$0xff]  ;;  %v269_v44 = vld [vmem:[%s2729_s26 + $0x1f0] sm:$0xff]  ;;  %v270_v45 = vld [vmem:[%s2729_s26 + $0x1f8] sm:$0xff] }
  0xeb   : > { %v1991_v24 = vcombine.high %v235_v25, %v236_v33 }
  0xf1   : > { %938 = vmatmul.mubr.bf16.gmra.mrb[44].mxu0 %v1984_v58  ;;  %1098 = vmatmul.mubr.bf16.gmra.mrb[44].mxu1 %v2016_v59  ;;  %v267_v58 = vld [vmem:[%s2729_s26 + $0x1e0] sm:$0xff]  ;;  %v268_v59 = vld [vmem:[%s2729_s26 + $0x1e8] sm:$0xff] }
  0xf2   : > { %947 = vmatprep.mubr.bf16.mxu0 %v1987_v60  ;;  %1107 = vmatprep.mubr.bf16.mxu1 %v2019_v61  ;;  %v1988_v60 = vcombine.low %v233_v10, %v234_v11  ;;  %v2020_v61 = vcombine.low %v265_v12, %v266_v15  ;;  %v2023_v22 = vcombine.high %v267_v58, %v268_v59  ;;  %v305_v12 = vlaneseq }
  0xf3   : > { %v1992_v10 = vcombine.low %v237_v42, %v238_v43  ;;  %v2024_v11 = vcombine.low %v269_v44, %v270_v45 }
  0xf4   : > { %v306_v15 = vshrl.u32 %v305_v12, 7 }
  0xf9   : > { %948 = vmatmul.mubr.bf16.gmra.mrb[48].mxu0 %v1986_v30  ;;  %1108 = vmatmul.mubr.bf16.gmra.mrb[48].mxu1 %v2018_v31  ;;  %v1990_v30 = vcombine.low %v235_v25, %v236_v33  ;;  %v2022_v31 = vcombine.low %v267_v58, %v268_v59  ;;  %v1148_v58 = vunpack.c.l.bf16 %v2740_v13  ;;  %v1212_v59 = vunpack.c.l.bf16 %v2748_v16 }
  0xfa   : > { %957 = vmatprep.mubr.bf16.mxu0 %v1989_v32  ;;  %1117 = vmatprep.mubr.bf16.mxu1 %v2021_v23  ;;  %v1993_v32 = vcombine.high %v237_v42, %v238_v43  ;;  %v2025_v23 = vcombine.high %v269_v44, %v270_v45  ;;  %v1149_v43 = vunpack.c.h.bf16 %v2740_v13  ;;  %v1213_v44 = vunpack.c.h.bf16 %v2748_v16 }
  0xfb   : > { %v1151_v13 = vunpack.c.h.bf16 %v2743_v14  ;;  %v1215_v16 = vunpack.c.h.bf16 %v2751_v17 }
 0x101   : > { %958 = vmatmul.mubr.bf16.gmra.mrb[52].mxu0 %v1988_v60  ;;  %1118 = vmatmul.mubr.bf16.gmra.mrb[52].mxu1 %v2020_v61  ;;  %v311_v60 = vsub.s32 1, %v306_v15 }
 0x102   : > { %967 = vmatprep.mubr.bf16.mxu0 %v1991_v24  ;;  %1127 = vmatprep.mubr.bf16.mxu1 %v2023_v22  ;;  %v307_v24 = vsub.s32 0, %v306_v15  ;;  %v303_v22 = vld [vmem:[%s3353_s2] sm:$0x3] }
 0x103   : > { %v2992_v33 = vrot.slane %v303_v22, %v311_v60 }
 0x104   : > { %v2990_v25 = vrot.slane %v303_v22, %v307_v24 }
 0x109   : > { %968 = vmatmul.mubr.bf16.gmra.mrb[56].mxu0 %v1990_v30  ;;  %1128 = vmatmul.mubr.bf16.gmra.mrb[56].mxu1 %v2022_v31 }
 0x10a   : > { %977 = vmatprep.mubr.bf16.mxu0 %v1993_v32  ;;  %1137 = vmatprep.mubr.bf16.mxu1 %v2025_v23  ;;  %v1150_v23 = vunpack.c.l.bf16 %v2743_v14 }
 0x111   : > { %978 = vmatmul.mubr.bf16.gmra.mrb[60].mxu0 %v1992_v10  ;;  %1138 = vmatmul.mubr.bf16.gmra.mrb[60].mxu1 %v2024_v11  ;;  %v1214_v10 = vunpack.c.l.bf16 %v2751_v17 }
 0x16c   : > { %v829_v61 = vpop.f32.mrb[0].mxu0  ;;  %v989_v42 = vpop.f32.mrb[0].mxu1 }
 0x16d   : > { %v830_v45 = vadd.f32 %v829_v61, %v2990_v25  ;;  %v990_v30 = vadd.f32 %v989_v42, %v2990_v25  ;;  %v831_v31 = vpop.f32.mrb[1].mxu0  ;;  %v991_v32 = vpop.f32.mrb[1].mxu1 }
 0x16e   : > { %v832_v11 = vadd.f32 %v831_v31, %v2992_v33  ;;  %v992_v12 = vadd.f32 %v991_v32, %v2992_v33  ;;  %v833_v15 = vpop.f32.mrb[2].mxu0  ;;  %v993_v24 = vpop.f32.mrb[2].mxu1 }
 0x16f   : > { %v1276_v22 = vadd.f32 %v1148_v58, %v830_v45  ;;  %v1340_v60 = vadd.f32 %v1212_v59, %v990_v30  ;;  %v834_v61 = vadd.f32 %v833_v15, %v2990_v25  ;;  %v994_v42 = vadd.f32 %v993_v24, %v2990_v25  ;;  %v835_v5 = vpop.f32.mrb[3].mxu0  ;;  %v995_v3 = vpop.f32.mrb[3].mxu1 }
 0x170   : > { %v1277_v4 = vadd.f32 %v1149_v43, %v832_v11  ;;  %v1341_v2 = vadd.f32 %v1213_v44, %v992_v12  ;;  %v836_v31 = vadd.f32 %v835_v5, %v2992_v33  ;;  %v996_v32 = vadd.f32 %v995_v3, %v2992_v33 }
 0x171   : > { %v1278_v53 = vadd.f32 %v1150_v23, %v834_v61  ;;  %v1342_v51 = vadd.f32 %v1214_v10, %v994_v42  ;;  %v1152_v59 = vunpack.c.l.bf16 %v2756_v38  ;;  %v1216_v45 = vunpack.c.l.bf16 %v2762_v40 }
 0x172   : > { %v2130_v14 = vpack.c.bf16 %v1277_v4, %v1276_v22  ;;  %v2162_v52 = vpack.c.bf16 %v1341_v2, %v1340_v60  ;;  %v1279_v17 = vadd.f32 %v1151_v13, %v836_v31  ;;  %v1343_v58 = vadd.f32 %v1215_v16, %v996_v32 }
 0x173   : > { %v1153_v2 = vunpack.c.h.bf16 %v2756_v38  ;;  %v1217_v44 = vunpack.c.h.bf16 %v2762_v40  ;;  %v1154_v12 = vunpack.c.l.bf16 %v2759_v39  ;;  %v1218_v15 = vunpack.c.l.bf16 %v2765_v41 }
 0x174   : > { %1788 = vst [vmem:[%s3014_s8] sm:$0xff] %v2130_v14  ;;  %1820 = vst [vmem:[%s3014_s8 + $0x100] sm:$0xff] %v2162_v52  ;;  %v2131_v3 = vpack.c.bf16 %v1279_v17, %v1278_v53  ;;  %v2163_v5 = vpack.c.bf16 %v1343_v58, %v1342_v51  ;;  %v839_v43 = vpop.f32.mrb[4].mxu0  ;;  %v999_v4 = vpop.f32.mrb[4].mxu1  ;;  %v1155_v40 = vunpack.c.h.bf16 %v2759_v39  ;;  %v1219_v24 = vunpack.c.h.bf16 %v2765_v41 }
 0x175   : > { %v840_v30 = vadd.f32 %v839_v43, %v2990_v25  ;;  %v1000_v23 = vadd.f32 %v999_v4, %v2990_v25  ;;  %v841_v10 = vpop.f32.mrb[5].mxu0  ;;  %v1001_v11 = vpop.f32.mrb[5].mxu1  ;;  %v1220_v43 = vunpack.c.l.bf16 %v2782_v48 }
 0x176   : > { %1789 = vst [vmem:[%s3014_s8 + $0x8] sm:$0xff] %v2131_v3  ;;  %1821 = vst [vmem:[%s3014_s8 + $0x108] sm:$0xff] %v2163_v5  ;;  %v842_v51 = vadd.f32 %v841_v10, %v2992_v33  ;;  %v1002_v52 = vadd.f32 %v1001_v11, %v2992_v33  ;;  %v843_v53 = vpop.f32.mrb[6].mxu0  ;;  %v1003_v38 = vpop.f32.mrb[6].mxu1  ;;  %v1156_v5 = vunpack.c.l.bf16 %v2776_v46  ;;  %v1221_v10 = vunpack.c.h.bf16 %v2782_v48 }
 0x177   : > { %v1280_v13 = vadd.f32 %v1152_v59, %v840_v30  ;;  %v1344_v16 = vadd.f32 %v1216_v45, %v1000_v23  ;;  %v844_v22 = vadd.f32 %v843_v53, %v2990_v25  ;;  %v1004_v60 = vadd.f32 %v1003_v38, %v2990_v25  ;;  %v845_v61 = vpop.f32.mrb[7].mxu0  ;;  %v1005_v42 = vpop.f32.mrb[7].mxu1 }
 0x178   : > { %v1281_v31 = vadd.f32 %v1153_v2, %v842_v51  ;;  %v1345_v32 = vadd.f32 %v1217_v44, %v1002_v52  ;;  %v846_v14 = vadd.f32 %v845_v61, %v2992_v33  ;;  %v1006_v17 = vadd.f32 %v1005_v42, %v2992_v33 }
 0x179   : > { %v1282_v58 = vadd.f32 %v1154_v12, %v844_v22  ;;  %v1346_v39 = vadd.f32 %v1218_v15, %v1004_v60  ;;  %v1157_v23 = vunpack.c.h.bf16 %v2776_v46  ;;  %v1158_v52 = vunpack.c.l.bf16 %v2779_v47 }
 0x17a   : > { %v2132_v3 = vpack.c.bf16 %v1281_v31, %v1280_v13  ;;  %v2164_v41 = vpack.c.bf16 %v1345_v32, %v1344_v16  ;;  %v1283_v59 = vadd.f32 %v1155_v40, %v846_v14  ;;  %v1347_v45 = vadd.f32 %v1219_v24, %v1006_v17 }
 0x17b   : > { %v1222_v53 = vunpack.c.l.bf16 %v2785_v49  ;;  %v1159_v48 = vunpack.c.h.bf16 %v2779_v47  ;;  %v1223_v13 = vunpack.c.h.bf16 %v2785_v49 }
 0x17c   : > { %1790 = vst [vmem:[%s3014_s8 + $0x10] sm:$0xff] %v2132_v3  ;;  %1822 = vst [vmem:[%s3014_s8 + $0x110] sm:$0xff] %v2164_v41  ;;  %v2133_v4 = vpack.c.bf16 %v1283_v59, %v1282_v58  ;;  %v2165_v2 = vpack.c.bf16 %v1347_v45, %v1346_v39  ;;  %v849_v44 = vpop.f32.mrb[8].mxu0  ;;  %v1009_v30 = vpop.f32.mrb[8].mxu1  ;;  %v1160_v45 = vunpack.c.l.bf16 %v2796_v54 }
 0x17d   : > { %v850_v11 = vadd.f32 %v849_v44, %v2990_v25  ;;  %v1010_v12 = vadd.f32 %v1009_v30, %v2990_v25  ;;  %v851_v15 = vpop.f32.mrb[9].mxu0  ;;  %v1011_v51 = vpop.f32.mrb[9].mxu1  ;;  %v1161_v30 = vunpack.c.h.bf16 %v2796_v54 }
 0x17e   : > { %1791 = vst [vmem:[%s3014_s8 + $0x18] sm:$0xff] %v2133_v4  ;;  %1823 = vst [vmem:[%s3014_s8 + $0x118] sm:$0xff] %v2165_v2  ;;  %v852_v38 = vadd.f32 %v851_v15, %v2992_v33  ;;  %v1012_v40 = vadd.f32 %v1011_v51, %v2992_v33  ;;  %v853_v24 = vpop.f32.mrb[10].mxu0  ;;  %v1013_v46 = vpop.f32.mrb[10].mxu1  ;;  %v1162_v51 = vunpack.c.l.bf16 %v2799_v55 }
 0x17f   : > { %v1284_v16 = vadd.f32 %v1156_v5, %v850_v11  ;;  %v1348_v22 = vadd.f32 %v1220_v43, %v1010_v12  ;;  %v854_v60 = vadd.f32 %v853_v24, %v2990_v25  ;;  %v1014_v61 = vadd.f32 %v1013_v46, %v2990_v25  ;;  %v855_v42 = vpop.f32.mrb[11].mxu0  ;;  %v1015_v31 = vpop.f32.mrb[11].mxu1 }
 0x180   : > { %v1285_v32 = vadd.f32 %v1157_v23, %v852_v38  ;;  %v1349_v14 = vadd.f32 %v1221_v10, %v1012_v40  ;;  %v856_v17 = vadd.f32 %v855_v42, %v2992_v33  ;;  %v1016_v58 = vadd.f32 %v1015_v31, %v2992_v33 }
 0x181   : > { %v1286_v39 = vadd.f32 %v1158_v52, %v854_v60  ;;  %v1350_v47 = vadd.f32 %v1222_v53, %v1014_v61  ;;  %v1224_v5 = vunpack.c.l.bf16 %v2802_v56  ;;  %v1225_v23 = vunpack.c.h.bf16 %v2802_v56 }
 0x182   : > { %v2134_v3 = vpack.c.bf16 %v1285_v32, %v1284_v16  ;;  %v2166_v49 = vpack.c.bf16 %v1349_v14, %v1348_v22  ;;  %v1287_v41 = vadd.f32 %v1159_v48, %v856_v17  ;;  %v1351_v59 = vadd.f32 %v1223_v13, %v1016_v58 }
 0x183   : > { %v1226_v52 = vunpack.c.l.bf16 %v2805_v57  ;;  %v1163_v56 = vunpack.c.h.bf16 %v2799_v55  ;;  %v1227_v24 = vunpack.c.h.bf16 %v2805_v57 }
 0x184   : > { %1792 = vst [vmem:[%s3014_s8 + $0x20] sm:$0xff] %v2134_v3  ;;  %1824 = vst [vmem:[%s3014_s8 + $0x120] sm:$0xff] %v2166_v49  ;;  %v2135_v43 = vpack.c.bf16 %v1287_v41, %v1286_v39  ;;  %v2167_v4 = vpack.c.bf16 %v1351_v59, %v1350_v47  ;;  %v859_v2 = vpop.f32.mrb[12].mxu0  ;;  %v1019_v44 = vpop.f32.mrb[12].mxu1  ;;  %v1164_v47 = vunpack.c.l.bf16 %v2816_v62  ;;  %v1228_v3 = vunpack.c.l.bf16 %v2822_v0 }
 0x185   : > { %v860_v10 = vadd.f32 %v859_v2, %v2990_v25  ;;  %v1020_v11 = vadd.f32 %v1019_v44, %v2990_v25  ;;  %v861_v12 = vpop.f32.mrb[13].mxu0  ;;  %v1021_v15 = vpop.f32.mrb[13].mxu1 }
 0x186   : > { %1793 = vst [vmem:[%s3014_s8 + $0x28] sm:$0xff] %v2135_v43  ;;  %1825 = vst [vmem:[%s3014_s8 + $0x128] sm:$0xff] %v2167_v4  ;;  %v862_v53 = vadd.f32 %v861_v12, %v2992_v33  ;;  %v1022_v38 = vadd.f32 %v1021_v15, %v2992_v33  ;;  %v863_v40 = vpop.f32.mrb[14].mxu0  ;;  %v1023_v54 = vpop.f32.mrb[14].mxu1  ;;  %v1229_v43 = vunpack.c.h.bf16 %v2822_v0  ;;  %v1167_v0 = vunpack.c.h.bf16 %v2819_v63 }
 0x187   : > { %v1288_v46 = vadd.f32 %v1160_v45, %v860_v10  ;;  %v1352_v48 = vadd.f32 %v1224_v5, %v1020_v11  ;;  %v864_v13 = vadd.f32 %v863_v40, %v2990_v25  ;;  %v1024_v16 = vadd.f32 %v1023_v54, %v2990_v25  ;;  %v865_v22 = vpop.f32.mrb[15].mxu0  ;;  %v1025_v60 = vpop.f32.mrb[15].mxu1 }
 0x188   : > { %v1289_v61 = vadd.f32 %v1161_v30, %v862_v53  ;;  %v1353_v42 = vadd.f32 %v1225_v23, %v1022_v38  ;;  %v866_v31 = vadd.f32 %v865_v22, %v2992_v33  ;;  %v1026_v32 = vadd.f32 %v1025_v60, %v2992_v33 }
 0x189   : > { %v1290_v14 = vadd.f32 %v1162_v51, %v864_v13  ;;  %v1354_v55 = vadd.f32 %v1226_v52, %v1024_v16  ;;  %v1165_v5 = vunpack.c.h.bf16 %v2816_v62  ;;  %v1166_v23 = vunpack.c.l.bf16 %v2819_v63 }
 0x18a   : > { %v2136_v17 = vpack.c.bf16 %v1289_v61, %v1288_v46  ;;  %v2168_v57 = vpack.c.bf16 %v1353_v42, %v1352_v48  ;;  %v1291_v58 = vadd.f32 %v1163_v56, %v866_v31  ;;  %v1355_v39 = vadd.f32 %v1227_v24, %v1026_v32 }
 0x18b   : > { %v1230_v10 = vunpack.c.l.bf16 %v2825_v1  ;;  %v1231_v51 = vunpack.c.h.bf16 %v2825_v1  ;;  %v1168_v42 = vunpack.c.l.bf16 %v2836_v6  ;;  %v1232_v31 = vunpack.c.l.bf16 %v2842_v8 }
 0x18c   : > { %1794 = vst [vmem:[%s3014_s8 + $0x30] sm:$0xff] %v2136_v17  ;;  %1826 = vst [vmem:[%s3014_s8 + $0x130] sm:$0xff] %v2168_v57  ;;  %v2137_v49 = vpack.c.bf16 %v1291_v58, %v1290_v14  ;;  %v2169_v41 = vpack.c.bf16 %v1355_v39, %v1354_v55  ;;  %v869_v59 = vpop.f32.mrb[16].mxu0  ;;  %v1029_v45 = vpop.f32.mrb[16].mxu1  ;;  %v1169_v57 = vunpack.c.h.bf16 %v2836_v6  ;;  %v1233_v58 = vunpack.c.h.bf16 %v2842_v8 }
 0x18d   : > { %v870_v4 = vadd.f32 %v869_v59, %v2990_v25  ;;  %v1030_v2 = vadd.f32 %v1029_v45, %v2990_v25  ;;  %v871_v44 = vpop.f32.mrb[17].mxu0  ;;  %v1031_v30 = vpop.f32.mrb[17].mxu1  ;;  %v1234_v59 = vunpack.c.l.bf16 %v2845_v9  ;;  %v1171_v8 = vunpack.c.h.bf16 %v2839_v7 }
 0x18e   : > { %1795 = vst [vmem:[%s3014_s8 + $0x38] sm:$0xff] %v2137_v49  ;;  %1827 = vst [vmem:[%s3014_s8 + $0x138] sm:$0xff] %v2169_v41  ;;  %v872_v11 = vadd.f32 %v871_v44, %v2992_v33  ;;  %v1032_v12 = vadd.f32 %v1031_v30, %v2992_v33  ;;  %v873_v15 = vpop.f32.mrb[18].mxu0  ;;  %v1033_v62 = vpop.f32.mrb[18].mxu1  ;;  %v1170_v41 = vunpack.c.l.bf16 %v2839_v7 }
 0x18f   : > { %v1292_v52 = vadd.f32 %v1164_v47, %v870_v4  ;;  %v1356_v53 = vadd.f32 %v1228_v3, %v1030_v2  ;;  %v874_v38 = vadd.f32 %v873_v15, %v2990_v25  ;;  %v1034_v40 = vadd.f32 %v1033_v62, %v2990_v25  ;;  %v875_v54 = vpop.f32.mrb[19].mxu0  ;;  %v1035_v56 = vpop.f32.mrb[19].mxu1 }
 0x190   : > { %v1293_v24 = vadd.f32 %v1165_v5, %v872_v11  ;;  %v1357_v46 = vadd.f32 %v1229_v43, %v1032_v12  ;;  %v876_v48 = vadd.f32 %v875_v54, %v2992_v33  ;;  %v1036_v13 = vadd.f32 %v1035_v56, %v2992_v33 }
 0x191   : > { %v1294_v16 = vadd.f32 %v1166_v23, %v874_v38  ;;  %v1358_v63 = vadd.f32 %v1230_v10, %v1034_v40  ;;  %v1235_v4 = vunpack.c.h.bf16 %v2845_v9  ;;  %v1172_v40 = vunpack.c.l.bf16 %v2856_v18 }
 0x192   : > { %v2138_v22 = vpack.c.bf16 %v1293_v24, %v1292_v52  ;;  %v2170_v1 = vpack.c.bf16 %v1357_v46, %v1356_v53  ;;  %v1295_v60 = vadd.f32 %v1167_v0, %v876_v48  ;;  %v1359_v61 = vadd.f32 %v1231_v51, %v1036_v13 }
 0x193   : > { %v1236_v54 = vunpack.c.l.bf16 %v2862_v20  ;;  %v1173_v13 = vunpack.c.h.bf16 %v2856_v18 }
 0x194   : > { %1796 = vst [vmem:[%s3014_s8 + $0x40] sm:$0xff] %v2138_v22  ;;  %1828 = vst [vmem:[%s3014_s8 + $0x140] sm:$0xff] %v2170_v1  ;;  %v2139_v32 = vpack.c.bf16 %v1295_v60, %v1294_v16  ;;  %v2171_v14 = vpack.c.bf16 %v1359_v61, %v1358_v63  ;;  %v879_v55 = vpop.f32.mrb[20].mxu0  ;;  %v1039_v17 = vpop.f32.mrb[20].mxu1  ;;  %v1237_v16 = vunpack.c.h.bf16 %v2862_v20  ;;  %v1174_v61 = vunpack.c.l.bf16 %v2859_v19 }
 0x195   : > { %v880_v39 = vadd.f32 %v879_v55, %v2990_v25  ;;  %v1040_v47 = vadd.f32 %v1039_v17, %v2990_v25  ;;  %v881_v3 = vpop.f32.mrb[21].mxu0  ;;  %v1041_v49 = vpop.f32.mrb[21].mxu1  ;;  %v1175_v20 = vunpack.c.h.bf16 %v2859_v19  ;;  %v1239_v55 = vunpack.c.h.bf16 %v2865_v21 }
 0x196   : > { %1797 = vst [vmem:[%s3014_s8 + $0x48] sm:$0xff] %v2139_v32  ;;  %1829 = vst [vmem:[%s3014_s8 + $0x148] sm:$0xff] %v2171_v14  ;;  %v882_v45 = vadd.f32 %v881_v3, %v2992_v33  ;;  %v1042_v5 = vadd.f32 %v1041_v49, %v2992_v33  ;;  %v883_v43 = vpop.f32.mrb[22].mxu0  ;;  %v1043_v6 = vpop.f32.mrb[22].mxu1 }
 0x197   : > { %v1296_v2 = vadd.f32 %v1168_v42, %v880_v39  ;;  %v1360_v44 = vadd.f32 %v1232_v31, %v1040_v47  ;;  %v884_v30 = vadd.f32 %v883_v43, %v2990_v25  ;;  %v1044_v23 = vadd.f32 %v1043_v6, %v2990_v25  ;;  %v885_v10 = vpop.f32.mrb[23].mxu0  ;;  %v1045_v11 = vpop.f32.mrb[23].mxu1 }
 0x198   : > { %v1297_v12 = vadd.f32 %v1169_v57, %v882_v45  ;;  %v1361_v15 = vadd.f32 %v1233_v58, %v1042_v5  ;;  %v886_v62 = vadd.f32 %v885_v10, %v2992_v33  ;;  %v1046_v0 = vadd.f32 %v1045_v11, %v2992_v33 }
 0x199   : > { %v1298_v51 = vadd.f32 %v1170_v41, %v884_v30  ;;  %v1362_v7 = vadd.f32 %v1234_v59, %v1044_v23  ;;  %v1238_v42 = vunpack.c.l.bf16 %v2865_v21  ;;  %v1177_v11 = vunpack.c.h.bf16 %v2876_v26 }
 0x19a   : > { %v2140_v52 = vpack.c.bf16 %v1297_v12, %v1296_v2  ;;  %v2172_v9 = vpack.c.bf16 %v1361_v15, %v1360_v44  ;;  %v1299_v53 = vadd.f32 %v1171_v8, %v886_v62  ;;  %v1363_v38 = vadd.f32 %v1235_v4, %v1046_v0 }
 0x19b   : > { %v1176_v4 = vunpack.c.l.bf16 %v2876_v26  ;;  %v1240_v2 = vunpack.c.l.bf16 %v2882_v28  ;;  %v1241_v12 = vunpack.c.h.bf16 %v2882_v28  ;;  %v1179_v28 = vunpack.c.h.bf16 %v2879_v27 }
 0x19c   : > { %1798 = vst [vmem:[%s3014_s8 + $0x50] sm:$0xff] %v2140_v52  ;;  %1830 = vst [vmem:[%s3014_s8 + $0x150] sm:$0xff] %v2172_v9  ;;  %v2141_v56 = vpack.c.bf16 %v1299_v53, %v1298_v51  ;;  %v2173_v24 = vpack.c.bf16 %v1363_v38, %v1362_v7  ;;  %v889_v46 = vpop.f32.mrb[24].mxu0  ;;  %v1049_v48 = vpop.f32.mrb[24].mxu1  ;;  %v1178_v7 = vunpack.c.l.bf16 %v2879_v27  ;;  %v1242_v52 = vunpack.c.l.bf16 %v2885_v29 }
 0x19d   : > { %v890_v63 = vadd.f32 %v889_v46, %v2990_v25  ;;  %v1050_v22 = vadd.f32 %v1049_v48, %v2990_v25  ;;  %v891_v1 = vpop.f32.mrb[25].mxu0  ;;  %v1051_v60 = vpop.f32.mrb[25].mxu1 }
 0x19e   : > { %1799 = vst [vmem:[%s3014_s8 + $0x58] sm:$0xff] %v2141_v56  ;;  %1831 = vst [vmem:[%s3014_s8 + $0x158] sm:$0xff] %v2173_v24  ;;  %v892_v31 = vadd.f32 %v891_v1, %v2992_v33  ;;  %v1052_v32 = vadd.f32 %v1051_v60, %v2992_v33  ;;  %v893_v14 = vpop.f32.mrb[26].mxu0  ;;  %v1053_v18 = vpop.f32.mrb[26].mxu1 }
 0x19f   : > { %v1300_v17 = vadd.f32 %v1172_v40, %v890_v63  ;;  %v1364_v57 = vadd.f32 %v1236_v54, %v1050_v22  ;;  %v894_v58 = vadd.f32 %v893_v14, %v2990_v25  ;;  %v1054_v39 = vadd.f32 %v1053_v18, %v2990_v25  ;;  %v895_v47 = vpop.f32.mrb[27].mxu0  ;;  %v1055_v3 = vpop.f32.mrb[27].mxu1 }
 0x1a0   : > { %v1301_v49 = vadd.f32 %v1173_v13, %v892_v31  ;;  %v1365_v41 = vadd.f32 %v1237_v16, %v1052_v32  ;;  %v896_v59 = vadd.f32 %v895_v47, %v2992_v33  ;;  %v1056_v45 = vadd.f32 %v1055_v3, %v2992_v33 }
 0x1a1   : > { %v1302_v5 = vadd.f32 %v1174_v61, %v894_v58  ;;  %v1366_v19 = vadd.f32 %v1238_v42, %v1054_v39  ;;  %v1243_v40 = vunpack.c.h.bf16 %v2885_v29  ;;  %v1180_v32 = vunpack.c.l.bf16 %v2896_v34 }
 0x1a2   : > { %v2142_v43 = vpack.c.bf16 %v1301_v49, %v1300_v17  ;;  %v2174_v21 = vpack.c.bf16 %v1365_v41, %v1364_v57  ;;  %v1303_v6 = vadd.f32 %v1175_v20, %v896_v59  ;;  %v1367_v8 = vadd.f32 %v1239_v55, %v1056_v45 }
 0x1a3   : > { %v1244_v14 = vunpack.c.l.bf16 %v2902_v36  ;;  %v1181_v57 = vunpack.c.h.bf16 %v2896_v34  ;;  %v1245_v58 = vunpack.c.h.bf16 %v2902_v36  ;;  %v1182_v41 = vunpack.c.l.bf16 %v2899_v35 }
 0x1a4   : > { %1800 = vst [vmem:[%s3014_s8 + $0x60] sm:$0xff] %v2142_v43  ;;  %1832 = vst [vmem:[%s3014_s8 + $0x160] sm:$0xff] %v2174_v21  ;;  %v2143_v44 = vpack.c.bf16 %v1303_v6, %v1302_v5  ;;  %v2175_v30 = vpack.c.bf16 %v1367_v8, %v1366_v19  ;;  %v899_v23 = vpop.f32.mrb[28].mxu0  ;;  %v1059_v10 = vpop.f32.mrb[28].mxu1  ;;  %v1246_v59 = vunpack.c.l.bf16 %v2905_v37  ;;  %v1183_v36 = vunpack.c.h.bf16 %v2899_v35 }
 0x1a5   : > { %v900_v15 = vadd.f32 %v899_v23, %v2990_v25  ;;  %v1060_v62 = vadd.f32 %v1059_v10, %v2990_v25  ;;  %v901_v0 = vpop.f32.mrb[29].mxu0  ;;  %v1061_v51 = vpop.f32.mrb[29].mxu1  ;;  %v1247_v43 = vunpack.c.h.bf16 %v2905_v37 }
 0x1a6   : > { %1801 = vst [vmem:[%s3014_s8 + $0x68] sm:$0xff] %v2143_v44  ;;  %1833 = vst [vmem:[%s3014_s8 + $0x168] sm:$0xff] %v2175_v30  ;;  %v902_v9 = vadd.f32 %v901_v0, %v2992_v33  ;;  %v1062_v53 = vadd.f32 %v1061_v51, %v2992_v33  ;;  %v903_v38 = vpop.f32.mrb[30].mxu0  ;;  %v1063_v26 = vpop.f32.mrb[30].mxu1  ;;  %v1184_v51 = vunpack.c.l.bf16 %v2916_v50 }
 0x1a7   : > { %v1304_v54 = vadd.f32 %v1176_v4, %v900_v15  ;;  %v1368_v56 = vadd.f32 %v1240_v2, %v1060_v62  ;;  %v904_v24 = vadd.f32 %v903_v38, %v2990_v25  ;;  %v1064_v46 = vadd.f32 %v1063_v26, %v2990_v25  ;;  %v905_v48 = vpop.f32.mrb[31].mxu0  ;;  %v1065_v13 = vpop.f32.mrb[31].mxu1 }
 0x1a8   : > { %v1305_v16 = vadd.f32 %v1177_v11, %v902_v9  ;;  %v1369_v63 = vadd.f32 %v1241_v12, %v1062_v53  ;;  %v906_v22 = vadd.f32 %v905_v48, %v2992_v33  ;;  %v1066_v1 = vadd.f32 %v1065_v13, %v2992_v33  ;;  %v3395_v48 = vld [vmem:[#allocation11_spill] sm:$0xff] }
 0x1a9   : > { %v1306_v60 = vadd.f32 %v1178_v7, %v904_v24  ;;  %v1370_v27 = vadd.f32 %v1242_v52, %v1064_v46  ;;  %v3394_v7 = vld [vmem:[#allocation12_spill] sm:$0xff]  ;;  %v1186_v13 = vunpack.c.l.bf16 %v3395_v48 }
 0x1aa   : > { %v2144_v61 = vpack.c.bf16 %v1305_v16, %v1304_v54  ;;  %v2176_v29 = vpack.c.bf16 %v1369_v63, %v1368_v56  ;;  %v1307_v42 = vadd.f32 %v1179_v28, %v906_v22  ;;  %v1371_v31 = vadd.f32 %v1243_v40, %v1066_v1  ;;  %v3396_v16 = vld [vmem:[#allocation13_spill] sm:$0xff] }
 0x1ab   : > { %v1248_v52 = vunpack.c.l.bf16 %v3394_v7  ;;  %v1185_v28 = vunpack.c.h.bf16 %v2916_v50  ;;  %v1249_v40 = vunpack.c.h.bf16 %v3394_v7  ;;  %v1250_v63 = vunpack.c.l.bf16 %v3396_v16 }
 0x1ac   : > { %1802 = vst [vmem:[%s3014_s8 + $0x70] sm:$0xff] %v2144_v61  ;;  %1834 = vst [vmem:[%s3014_s8 + $0x170] sm:$0xff] %v2176_v29  ;;  %v2145_v18 = vpack.c.bf16 %v1307_v42, %v1306_v60  ;;  %v2177_v20 = vpack.c.bf16 %v1371_v31, %v1370_v27  ;;  %v909_v55 = vpop.f32.mrb[32].mxu0  ;;  %v1069_v17 = vpop.f32.mrb[32].mxu1  ;;  %v1187_v27 = vunpack.c.h.bf16 %v3395_v48  ;;  %v1251_v61 = vunpack.c.h.bf16 %v3396_v16 }
 0x1ad   : > { %v910_v39 = vadd.f32 %v909_v55, %v2990_v25  ;;  %v1070_v47 = vadd.f32 %v1069_v17, %v2990_v25  ;;  %v911_v3 = vpop.f32.mrb[33].mxu0  ;;  %v1071_v49 = vpop.f32.mrb[33].mxu1 }
 0x1ae   : > { %1803 = vst [vmem:[%s3014_s8 + $0x78] sm:$0xff] %v2145_v18  ;;  %1835 = vst [vmem:[%s3014_s8 + $0x178] sm:$0xff] %v2177_v20  ;;  %v912_v45 = vadd.f32 %v911_v3, %v2992_v33  ;;  %v1072_v5 = vadd.f32 %v1071_v49, %v2992_v33  ;;  %v913_v19 = vpop.f32.mrb[34].mxu0  ;;  %v1073_v34 = vpop.f32.mrb[34].mxu1 }
 0x1af   : > { %v1308_v21 = vadd.f32 %v1180_v32, %v910_v39  ;;  %v1372_v6 = vadd.f32 %v1244_v14, %v1070_v47  ;;  %v914_v8 = vadd.f32 %v913_v19, %v2990_v25  ;;  %v1074_v4 = vadd.f32 %v1073_v34, %v2990_v25  ;;  %v915_v2 = vpop.f32.mrb[35].mxu0  ;;  %v1075_v44 = vpop.f32.mrb[35].mxu1 }
 0x1b0   : > { %v1309_v30 = vadd.f32 %v1181_v57, %v912_v45  ;;  %v1373_v23 = vadd.f32 %v1245_v58, %v1072_v5  ;;  %v916_v10 = vadd.f32 %v915_v2, %v2992_v33  ;;  %v1076_v11 = vadd.f32 %v1075_v44, %v2992_v33  ;;  %v3398_v5 = vld [vmem:[#allocation16_spill] sm:$0xff] }
 0x1b1   : > { %v1310_v12 = vadd.f32 %v1182_v41, %v914_v8  ;;  %v1374_v35 = vadd.f32 %v1246_v59, %v1074_v4  ;;  %v3397_v59 = vld [vmem:[#allocation14_spill] sm:$0xff]  ;;  %v1252_v19 = vunpack.c.l.bf16 %v3398_v5  ;;  %v1253_v8 = vunpack.c.h.bf16 %v3398_v5 }
 0x1b2   : > { %v2146_v15 = vpack.c.bf16 %v1309_v30, %v1308_v21  ;;  %v2178_v37 = vpack.c.bf16 %v1373_v23, %v1372_v6  ;;  %v1311_v62 = vadd.f32 %v1183_v36, %v916_v10  ;;  %v1375_v0 = vadd.f32 %v1247_v43, %v1076_v11  ;;  %v3399_v23 = vld [vmem:[#allocation15_spill] sm:$0xff]  ;;  %v3400_v11 = vld [vmem:[#allocation17_spill] sm:$0xff] }
 0x1b3   : > { %v1188_v45 = vunpack.c.l.bf16 %v3397_v59  ;;  %v1189_v6 = vunpack.c.h.bf16 %v3397_v59  ;;  %v1190_v10 = vunpack.c.l.bf16 %v3399_v23 }
 0x1b4   : > { %1804 = vst [vmem:[%s3014_s8 + $0x80] sm:$0xff] %v2146_v15  ;;  %1836 = vst [vmem:[%s3014_s8 + $0x180] sm:$0xff] %v2178_v37  ;;  %v2147_v9 = vpack.c.bf16 %v1311_v62, %v1310_v12  ;;  %v2179_v53 = vpack.c.bf16 %v1375_v0, %v1374_v35  ;;  %v919_v38 = vpop.f32.mrb[36].mxu0  ;;  %v1079_v26 = vpop.f32.mrb[36].mxu1  ;;  %v1254_v12 = vunpack.c.l.bf16 %v3400_v11  ;;  %v1191_v0 = vunpack.c.h.bf16 %v3399_v23 }
 0x1b5   : > { %v920_v54 = vadd.f32 %v919_v38, %v2990_v25  ;;  %v1080_v56 = vadd.f32 %v1079_v26, %v2990_v25  ;;  %v921_v24 = vpop.f32.mrb[37].mxu0  ;;  %v1081_v46 = vpop.f32.mrb[37].mxu1 }
 0x1b6   : > { %1805 = vst [vmem:[%s3014_s8 + $0x88] sm:$0xff] %v2147_v9  ;;  %1837 = vst [vmem:[%s3014_s8 + $0x188] sm:$0xff] %v2179_v53  ;;  %v922_v22 = vadd.f32 %v921_v24, %v2992_v33  ;;  %v1082_v1 = vadd.f32 %v1081_v46, %v2992_v33  ;;  %v923_v60 = vpop.f32.mrb[38].mxu0  ;;  %v1083_v50 = vpop.f32.mrb[38].mxu1 }
 0x1b7   : > { %v1312_v29 = vadd.f32 %v1184_v51, %v920_v54  ;;  %v1376_v42 = vadd.f32 %v1248_v52, %v1080_v56  ;;  %v924_v31 = vadd.f32 %v923_v60, %v2990_v25  ;;  %v1084_v32 = vadd.f32 %v1083_v50, %v2990_v25  ;;  %v925_v14 = vpop.f32.mrb[39].mxu0  ;;  %v1085_v18 = vpop.f32.mrb[39].mxu1  ;;  %v3402_v60 = vld [vmem:[#allocation19_spill] sm:$0xff] }
 0x1b8   : > { %v1313_v20 = vadd.f32 %v1185_v28, %v922_v22  ;;  %v1377_v55 = vadd.f32 %v1249_v40, %v1082_v1  ;;  %v926_v17 = vadd.f32 %v925_v14, %v2992_v33  ;;  %v1086_v57 = vadd.f32 %v1085_v18, %v2992_v33  ;;  %v3401_v22 = vld [vmem:[#allocation18_spill] sm:$0xff]  ;;  %v2402_v14 = vld [vmem:[%s2729_s26 + $0x1b0] sm:$0xff] }
 0x1b9   : > { %v1314_v58 = vadd.f32 %v1186_v13, %v924_v31  ;;  %v1378_v39 = vadd.f32 %v1250_v63, %v1084_v32  ;;  %v1255_v51 = vunpack.c.h.bf16 %v3400_v11  ;;  %v1192_v1 = vunpack.c.l.bf16 %v3401_v22  ;;  %v2401_v31 = vld [vmem:[%s2729_s26 + $0xb0] sm:$0xff] }
 0x1ba   : > { %v2148_v47 = vpack.c.bf16 %v1313_v20, %v1312_v29  ;;  %v2180_v3 = vpack.c.bf16 %v1377_v55, %v1376_v42  ;;  %v1315_v49 = vadd.f32 %v1187_v27, %v926_v17  ;;  %v1379_v41 = vadd.f32 %v1251_v61, %v1086_v57 }
 0x1bb   : > { %v1256_v50 = vunpack.c.l.bf16 %v3402_v60  ;;  %v1193_v32 = vunpack.c.h.bf16 %v2401_v31  ;;  %v1257_v18 = vunpack.c.h.bf16 %v2402_v14 }
 0x1bc   : > { %1806 = vst [vmem:[%s3014_s8 + $0x90] sm:$0xff] %v2148_v47  ;;  %1838 = vst [vmem:[%s3014_s8 + $0x190] sm:$0xff] %v2180_v3  ;;  %v2149_v34 = vpack.c.bf16 %v1315_v49, %v1314_v58  ;;  %v2181_v36 = vpack.c.bf16 %v1379_v41, %v1378_v39  ;;  %v929_v43 = vpop.f32.mrb[40].mxu0  ;;  %v1089_v21 = vpop.f32.mrb[40].mxu1  ;;  %v2403_v58 = vld [vmem:[%s2729_s26 + $0xb8] sm:$0xff] }
 0x1bd   : > { %v930_v4 = vadd.f32 %v929_v43, %v2990_v25  ;;  %v1090_v2 = vadd.f32 %v1089_v21, %v2990_v25  ;;  %v931_v44 = vpop.f32.mrb[41].mxu0  ;;  %v1091_v30 = vpop.f32.mrb[41].mxu1  ;;  %v1194_v39 = vunpack.c.l.bf16 %v2403_v58  ;;  %v2404_v47 = vld [vmem:[%s2729_s26 + $0x1b8] sm:$0xff]  ;;  %v1195_v5 = vunpack.c.h.bf16 %v2403_v58 }
 0x1be   : > { %1807 = vst [vmem:[%s3014_s8 + $0x98] sm:$0xff] %v2149_v34  ;;  %1839 = vst [vmem:[%s3014_s8 + $0x198] sm:$0xff] %v2181_v36  ;;  %v932_v35 = vadd.f32 %v931_v44, %v2992_v33  ;;  %v1092_v15 = vadd.f32 %v1091_v30, %v2992_v33  ;;  %v933_v37 = vpop.f32.mrb[42].mxu0  ;;  %v1093_v62 = vpop.f32.mrb[42].mxu1  ;;  %v1258_v3 = vunpack.c.l.bf16 %v2404_v47 }
 0x1bf   : > { %v1316_v7 = vadd.f32 %v1188_v45, %v930_v4  ;;  %v1380_v52 = vadd.f32 %v1252_v19, %v1090_v2  ;;  %v934_v9 = vadd.f32 %v933_v37, %v2990_v25  ;;  %v1094_v53 = vadd.f32 %v1093_v62, %v2990_v25  ;;  %v935_v38 = vpop.f32.mrb[43].mxu0  ;;  %v1095_v26 = vpop.f32.mrb[43].mxu1  ;;  %v2405_v37 = vld [vmem:[%s2729_s26 + $0xc0] sm:$0xff] }
 0x1c0   : > { %v1317_v28 = vadd.f32 %v1189_v6, %v932_v35  ;;  %v1381_v40 = vadd.f32 %v1253_v8, %v1092_v15  ;;  %v936_v54 = vadd.f32 %v935_v38, %v2992_v33  ;;  %v1096_v56 = vadd.f32 %v1095_v26, %v2992_v33 }
 0x1c1   : > { %v1318_v24 = vadd.f32 %v1190_v10, %v934_v9  ;;  %v1382_v46 = vadd.f32 %v1254_v12, %v1094_v53  ;;  %v1259_v19 = vunpack.c.h.bf16 %v2404_v47  ;;  %v1196_v62 = vunpack.c.l.bf16 %v2405_v37 }
 0x1c2   : > { %v2150_v48 = vpack.c.bf16 %v1317_v28, %v1316_v7  ;;  %v2182_v13 = vpack.c.bf16 %v1381_v40, %v1380_v52  ;;  %v1319_v16 = vadd.f32 %v1191_v0, %v936_v54  ;;  %v1383_v63 = vadd.f32 %v1255_v51, %v1096_v56  ;;  %v2406_v0 = vld [vmem:[%s2729_s26 + $0x1c0] sm:$0xff] }
 0x1c3   : > { %v1260_v51 = vunpack.c.l.bf16 %v2406_v0  ;;  %v1197_v38 = vunpack.c.h.bf16 %v2405_v37  ;;  %v1261_v26 = vunpack.c.h.bf16 %v2406_v0 }
 0x1c4   : > { %1808 = vst [vmem:[%s3014_s8 + $0xa0] sm:$0xff] %v2150_v48  ;;  %1840 = vst [vmem:[%s3014_s8 + $0x1a0] sm:$0xff] %v2182_v13  ;;  %v2151_v27 = vpack.c.bf16 %v1319_v16, %v1318_v24  ;;  %v2183_v61 = vpack.c.bf16 %v1383_v63, %v1382_v46  ;;  %v939_v29 = vpop.f32.mrb[44].mxu0  ;;  %v1099_v42 = vpop.f32.mrb[44].mxu1  ;;  %v2407_v24 = vld [vmem:[%s2729_s26 + $0xc8] sm:$0xff] }
 0x1c5   : > { %v940_v20 = vadd.f32 %v939_v29, %v2990_v25  ;;  %v1100_v55 = vadd.f32 %v1099_v42, %v2990_v25  ;;  %v941_v17 = vpop.f32.mrb[45].mxu0  ;;  %v1101_v57 = vpop.f32.mrb[45].mxu1  ;;  %v1198_v46 = vunpack.c.l.bf16 %v2407_v24  ;;  %v2408_v48 = vld [vmem:[%s2729_s26 + $0x1c8] sm:$0xff]  ;;  %v1199_v60 = vunpack.c.h.bf16 %v2407_v24 }
 0x1c6   : > { %1809 = vst [vmem:[%s3014_s8 + $0xa8] sm:$0xff] %v2151_v27  ;;  %1841 = vst [vmem:[%s3014_s8 + $0x1a8] sm:$0xff] %v2183_v61  ;;  %v942_v49 = vadd.f32 %v941_v17, %v2992_v33  ;;  %v1102_v41 = vadd.f32 %v1101_v57, %v2992_v33  ;;  %v943_v59 = vpop.f32.mrb[46].mxu0  ;;  %v1103_v45 = vpop.f32.mrb[46].mxu1  ;;  %v1262_v13 = vunpack.c.l.bf16 %v2408_v48 }
 0x1c7   : > { %v1320_v34 = vadd.f32 %v1192_v1, %v940_v20  ;;  %v1384_v36 = vadd.f32 %v1256_v50, %v1100_v55  ;;  %v944_v43 = vadd.f32 %v943_v59, %v2990_v25  ;;  %v1104_v21 = vadd.f32 %v1103_v45, %v2990_v25  ;;  %v945_v6 = vpop.f32.mrb[47].mxu0  ;;  %v1105_v8 = vpop.f32.mrb[47].mxu1  ;;  %v2410_v59 = vld [vmem:[%s2729_s26 + $0x1d0] sm:$0xff] }
 0x1c8   : > { %v1321_v4 = vadd.f32 %v1193_v32, %v942_v49  ;;  %v1385_v2 = vadd.f32 %v1257_v18, %v1102_v41  ;;  %v946_v44 = vadd.f32 %v945_v6, %v2992_v33  ;;  %v1106_v30 = vadd.f32 %v1105_v8, %v2992_v33  ;;  %v2409_v49 = vld [vmem:[%s2729_s26 + $0xd0] sm:$0xff] }
 0x1c9   : > { %v1322_v23 = vadd.f32 %v1194_v39, %v944_v43  ;;  %v1386_v10 = vadd.f32 %v1258_v3, %v1104_v21  ;;  %v1263_v50 = vunpack.c.h.bf16 %v2408_v48  ;;  %v1200_v41 = vunpack.c.l.bf16 %v2409_v49 }
 0x1ca   : > { %v2152_v11 = vpack.c.bf16 %v1321_v4, %v1320_v34  ;;  %v2184_v12 = vpack.c.bf16 %v1385_v2, %v1384_v36  ;;  %v1323_v35 = vadd.f32 %v1195_v5, %v946_v44  ;;  %v1387_v15 = vadd.f32 %v1259_v19, %v1106_v30  ;;  %v2411_v44 = vld [vmem:[%s2729_s26 + $0xd8] sm:$0xff] }
 0x1cb   : > { %v1264_v45 = vunpack.c.l.bf16 %v2410_v59  ;;  %v1201_v43 = vunpack.c.h.bf16 %v2409_v49  ;;  %v1265_v21 = vunpack.c.h.bf16 %v2410_v59  ;;  %v1202_v30 = vunpack.c.l.bf16 %v2411_v44 }
 0x1cc   : > { %1810 = vst [vmem:[%s3014_s8 + $0xb0] sm:$0xff] %v2152_v11  ;;  %1842 = vst [vmem:[%s3014_s8 + $0x1b0] sm:$0xff] %v2184_v12  ;;  %v2153_v7 = vpack.c.bf16 %v1323_v35, %v1322_v23  ;;  %v2185_v52 = vpack.c.bf16 %v1387_v15, %v1386_v10  ;;  %v949_v9 = vpop.f32.mrb[48].mxu0  ;;  %v1109_v53 = vpop.f32.mrb[48].mxu1  ;;  %v2412_v23 = vld [vmem:[%s2729_s26 + $0x1d8] sm:$0xff]  ;;  %v1203_v37 = vunpack.c.h.bf16 %v2411_v44 }
 0x1cd   : > { %v950_v28 = vadd.f32 %v949_v9, %v2990_v25  ;;  %v1110_v40 = vadd.f32 %v1109_v53, %v2990_v25  ;;  %v951_v54 = vpop.f32.mrb[49].mxu0  ;;  %v1111_v56 = vpop.f32.mrb[49].mxu1  ;;  %v1266_v10 = vunpack.c.l.bf16 %v2412_v23 }
 0x1ce   : > { %1811 = vst [vmem:[%s3014_s8 + $0xb8] sm:$0xff] %v2153_v7  ;;  %1843 = vst [vmem:[%s3014_s8 + $0x1b8] sm:$0xff] %v2185_v52  ;;  %v952_v16 = vadd.f32 %v951_v54, %v2992_v33  ;;  %v1112_v63 = vadd.f32 %v1111_v56, %v2992_v33  ;;  %v953_v22 = vpop.f32.mrb[50].mxu0  ;;  %v1113_v1 = vpop.f32.mrb[50].mxu1 }
 0x1cf   : > { %v1324_v27 = vadd.f32 %v1196_v62, %v950_v28  ;;  %v1388_v61 = vadd.f32 %v1260_v51, %v1110_v40  ;;  %v954_v29 = vadd.f32 %v953_v22, %v2990_v25  ;;  %v1114_v42 = vadd.f32 %v1113_v1, %v2990_v25  ;;  %v955_v31 = vpop.f32.mrb[51].mxu0  ;;  %v1115_v32 = vpop.f32.mrb[51].mxu1  ;;  %v2414_v22 = vld [vmem:[%s2729_s26 + $0x1e0] sm:$0xff] }
 0x1d0   : > { %v1325_v14 = vadd.f32 %v1197_v38, %v952_v16  ;;  %v1389_v18 = vadd.f32 %v1261_v26, %v1112_v63  ;;  %v956_v20 = vadd.f32 %v955_v31, %v2992_v33  ;;  %v1116_v55 = vadd.f32 %v1115_v32, %v2992_v33  ;;  %v2413_v16 = vld [vmem:[%s2729_s26 + $0xe0] sm:$0xff] }
 0x1d1   : > { %v1326_v17 = vadd.f32 %v1198_v46, %v954_v29  ;;  %v1390_v57 = vadd.f32 %v1262_v13, %v1114_v42  ;;  %v1267_v62 = vunpack.c.h.bf16 %v2412_v23  ;;  %v1204_v63 = vunpack.c.l.bf16 %v2413_v16 }
 0x1d2   : > { %v2154_v58 = vpack.c.bf16 %v1325_v14, %v1324_v27  ;;  %v2186_v39 = vpack.c.bf16 %v1389_v18, %v1388_v61  ;;  %v1327_v47 = vadd.f32 %v1199_v60, %v956_v20  ;;  %v1391_v3 = vadd.f32 %v1263_v50, %v1116_v55  ;;  %v2415_v20 = vld [vmem:[%s2729_s26 + $0xe8] sm:$0xff] }
 0x1d3   : > { %v1268_v1 = vunpack.c.l.bf16 %v2414_v22  ;;  %v1205_v29 = vunpack.c.h.bf16 %v2413_v16  ;;  %v1269_v42 = vunpack.c.h.bf16 %v2414_v22  ;;  %v1206_v55 = vunpack.c.l.bf16 %v2415_v20 }
 0x1d4   : > { %1812 = vst [vmem:[%s3014_s8 + $0xc0] sm:$0xff] %v2154_v58  ;;  %1844 = vst [vmem:[%s3014_s8 + $0x1c0] sm:$0xff] %v2186_v39  ;;  %v2155_v5 = vpack.c.bf16 %v1327_v47, %v1326_v17  ;;  %v2187_v19 = vpack.c.bf16 %v1391_v3, %v1390_v57  ;;  %v959_v34 = vpop.f32.mrb[52].mxu0  ;;  %v1119_v36 = vpop.f32.mrb[52].mxu1  ;;  %v2416_v17 = vld [vmem:[%s2729_s26 + $0x1e8] sm:$0xff]  ;;  %v1207_v49 = vunpack.c.h.bf16 %v2415_v20 }
 0x1d5   : > { %v960_v6 = vadd.f32 %v959_v34, %v2990_v25  ;;  %v1120_v8 = vadd.f32 %v1119_v36, %v2990_v25  ;;  %v961_v4 = vpop.f32.mrb[53].mxu0  ;;  %v1121_v2 = vpop.f32.mrb[53].mxu1  ;;  %v1270_v57 = vunpack.c.l.bf16 %v2416_v17 }
 0x1d6   : > { %1813 = vst [vmem:[%s3014_s8 + $0xc8] sm:$0xff] %v2155_v5  ;;  %1845 = vst [vmem:[%s3014_s8 + $0x1c8] sm:$0xff] %v2187_v19  ;;  %v962_v11 = vadd.f32 %v961_v4, %v2992_v33  ;;  %v1122_v12 = vadd.f32 %v1121_v2, %v2992_v33  ;;  %v963_v35 = vpop.f32.mrb[54].mxu0  ;;  %v1123_v15 = vpop.f32.mrb[54].mxu1 }
 0x1d7   : > { %v1328_v0 = vadd.f32 %v1200_v41, %v960_v6  ;;  %v1392_v51 = vadd.f32 %v1264_v45, %v1120_v8  ;;  %v964_v7 = vadd.f32 %v963_v35, %v2990_v25  ;;  %v1124_v52 = vadd.f32 %v1123_v15, %v2990_v25  ;;  %v965_v9 = vpop.f32.mrb[55].mxu0  ;;  %v1125_v53 = vpop.f32.mrb[55].mxu1  ;;  %v2418_v35 = vld [vmem:[%s2729_s26 + $0x1f0] sm:$0xff] }
 0x1d8   : > { %v1329_v38 = vadd.f32 %v1201_v43, %v962_v11  ;;  %v1393_v26 = vadd.f32 %v1265_v21, %v1122_v12  ;;  %v966_v28 = vadd.f32 %v965_v9, %v2992_v33  ;;  %v1126_v40 = vadd.f32 %v1125_v53, %v2992_v33  ;;  %v2417_v11 = vld [vmem:[%s2729_s26 + $0xf0] sm:$0xff] }
 0x1d9   : > { %v1330_v54 = vadd.f32 %v1202_v30, %v964_v7  ;;  %v1394_v56 = vadd.f32 %v1266_v10, %v1124_v52  ;;  %v1271_v41 = vunpack.c.h.bf16 %v2416_v17  ;;  %v1208_v12 = vunpack.c.l.bf16 %v2417_v11 }
 0x1da   : > { %v2156_v24 = vpack.c.bf16 %v1329_v38, %v1328_v0  ;;  %v2188_v46 = vpack.c.bf16 %v1393_v26, %v1392_v51  ;;  %v1331_v48 = vadd.f32 %v1203_v37, %v966_v28  ;;  %v1395_v13 = vadd.f32 %v1267_v62, %v1126_v40  ;;  %v2419_v28 = vld [vmem:[%s2729_s26 + $0xf8] sm:$0xff] }
 0x1db   : > { %v1272_v15 = vunpack.c.l.bf16 %v2418_v35  ;;  %v1209_v7 = vunpack.c.h.bf16 %v2417_v11  ;;  %v1273_v52 = vunpack.c.h.bf16 %v2418_v35  ;;  %v1210_v40 = vunpack.c.l.bf16 %v2419_v28 }
 0x1dc   : > { %1814 = vst [vmem:[%s3014_s8 + $0xd0] sm:$0xff] %v2156_v24  ;;  %1846 = vst [vmem:[%s3014_s8 + $0x1d0] sm:$0xff] %v2188_v46  ;;  %v2157_v60 = vpack.c.bf16 %v1331_v48, %v1330_v54  ;;  %v2189_v50 = vpack.c.bf16 %v1395_v13, %v1394_v56  ;;  %v969_v27 = vpop.f32.mrb[56].mxu0  ;;  %v1129_v61 = vpop.f32.mrb[56].mxu1  ;;  %v2420_v54 = vld [vmem:[%s2729_s26 + $0x1f8] sm:$0xff]  ;;  %v1211_v16 = vunpack.c.h.bf16 %v2419_v28 }
 0x1dd   : > { %v970_v31 = vadd.f32 %v969_v27, %v2990_v25  ;;  %v1130_v32 = vadd.f32 %v1129_v61, %v2990_v25  ;;  %v971_v14 = vpop.f32.mrb[57].mxu0  ;;  %v1131_v18 = vpop.f32.mrb[57].mxu1  ;;  %v1274_v56 = vunpack.c.l.bf16 %v2420_v54 }
 0x1de   : > { %1815 = vst [vmem:[%s3014_s8 + $0xd8] sm:$0xff] %v2157_v60  ;;  %1847 = vst [vmem:[%s3014_s8 + $0x1d8] sm:$0xff] %v2189_v50  ;;  %v972_v58 = vadd.f32 %v971_v14, %v2992_v33  ;;  %v1132_v39 = vadd.f32 %v1131_v18, %v2992_v33  ;;  %v973_v47 = vpop.f32.mrb[58].mxu0  ;;  %v1133_v3 = vpop.f32.mrb[58].mxu1 }
 0x1df   : > { %v1332_v59 = vadd.f32 %v1204_v63, %v970_v31  ;;  %v1396_v45 = vadd.f32 %v1268_v1, %v1130_v32  ;;  %v974_v5 = vadd.f32 %v973_v47, %v2990_v25  ;;  %v1134_v19 = vadd.f32 %v1133_v3, %v2990_v25  ;;  %v975_v34 = vpop.f32.mrb[59].mxu0  ;;  %v1135_v36 = vpop.f32.mrb[59].mxu1 }
 0x1e0   : > { %v1333_v43 = vadd.f32 %v1205_v29, %v972_v58  ;;  %v1397_v21 = vadd.f32 %v1269_v42, %v1132_v39  ;;  %v976_v6 = vadd.f32 %v975_v34, %v2992_v33  ;;  %v1136_v8 = vadd.f32 %v1135_v36, %v2992_v33 }
 0x1e1   : > { %v1334_v4 = vadd.f32 %v1206_v55, %v974_v5  ;;  %v1398_v2 = vadd.f32 %v1270_v57, %v1134_v19  ;;  %v1275_v63 = vunpack.c.h.bf16 %v2420_v54 }
 0x1e2   : > { %v2158_v44 = vpack.c.bf16 %v1333_v43, %v1332_v59  ;;  %v2190_v30 = vpack.c.bf16 %v1397_v21, %v1396_v45  ;;  %v1335_v23 = vadd.f32 %v1207_v49, %v976_v6  ;;  %v1399_v10 = vadd.f32 %v1271_v41, %v1136_v8 }
 0x1e4   : > { %1816 = vst [vmem:[%s3014_s8 + $0xe0] sm:$0xff] %v2158_v44  ;;  %1848 = vst [vmem:[%s3014_s8 + $0x1e0] sm:$0xff] %v2190_v30  ;;  %v2159_v37 = vpack.c.bf16 %v1335_v23, %v1334_v4  ;;  %v2191_v62 = vpack.c.bf16 %v1399_v10, %v1398_v2  ;;  %v979_v0 = vpop.f32.mrb[60].mxu0  ;;  %v1139_v51 = vpop.f32.mrb[60].mxu1 }
 0x1e5   : > { %v980_v9 = vadd.f32 %v979_v0, %v2990_v25  ;;  %v1140_v53 = vadd.f32 %v1139_v51, %v2990_v25  ;;  %v981_v38 = vpop.f32.mrb[61].mxu0  ;;  %v1141_v26 = vpop.f32.mrb[61].mxu1 }
 0x1e6   : > { %1817 = vst [vmem:[%s3014_s8 + $0xe8] sm:$0xff] %v2159_v37  ;;  %1849 = vst [vmem:[%s3014_s8 + $0x1e8] sm:$0xff] %v2191_v62  ;;  %v982_v24 = vadd.f32 %v981_v38, %v2992_v33  ;;  %v1142_v46 = vadd.f32 %v1141_v26, %v2992_v33  ;;  %v983_v48 = vpop.f32.mrb[62].mxu0  ;;  %v1143_v13 = vpop.f32.mrb[62].mxu1 }
 0x1e7   : > { %v1336_v22 = vadd.f32 %v1208_v12, %v980_v9  ;;  %v1400_v1 = vadd.f32 %v1272_v15, %v1140_v53  ;;  %v984_v60 = vadd.f32 %v983_v48, %v2990_v25  ;;  %v1144_v50 = vadd.f32 %v1143_v13, %v2990_v25  ;;  %v985_v27 = vpop.f32.mrb[63].mxu0  ;;  %v1145_v61 = vpop.f32.mrb[63].mxu1 }
 0x1e8   : > { %v1337_v29 = vadd.f32 %v1209_v7, %v982_v24  ;;  %v1401_v42 = vadd.f32 %v1273_v52, %v1142_v46  ;;  %v986_v31 = vadd.f32 %v985_v27, %v2992_v33  ;;  %v1146_v32 = vadd.f32 %v1145_v61, %v2992_v33 }
 0x1e9   : > { %v1338_v14 = vadd.f32 %v1210_v40, %v984_v60  ;;  %v1402_v18 = vadd.f32 %v1274_v56, %v1144_v50 }
 0x1ea   : > { %v2160_v20 = vpack.c.bf16 %v1337_v29, %v1336_v22  ;;  %v2192_v25 = vpack.c.bf16 %v1401_v42, %v1400_v1  ;;  %v1339_v55 = vadd.f32 %v1211_v16, %v986_v31  ;;  %v1403_v17 = vadd.f32 %v1275_v63, %v1146_v32 }
 0x1ec   : > { %1818 = vst [vmem:[%s3014_s8 + $0xf0] sm:$0xff] %v2160_v20  ;;  %1850 = vst [vmem:[%s3014_s8 + $0x1f0] sm:$0xff] %v2192_v25  ;;  %v2161_v33 = vpack.c.bf16 %v1339_v55, %v1338_v14  ;;  %v2193_v57 = vpack.c.bf16 %v1403_v17, %v1402_v18 }
 0x1ee   : > { %1819 = vst [vmem:[%s3014_s8 + $0xf8] sm:$0xff] %v2161_v33  ;;  %1851 = vst [vmem:[%s3014_s8 + $0x1f8] sm:$0xff] %v2193_v57 }
 0x1ef   : > { %2492 = shalt.err (!%p2489_p7)
}
 0x1f0   : > { %s2493_s30 = scalar_lea.hbm %s3301_s11, 8192  ;;  %s2497_s10 = scalar_lea.hbm %s3354_s3, 16384 }
 0x1f1   : > { %p2494_p9 = scmp.ne.s32.totalorder %s3301_s11, %s2493_s30  ;;  %p2498_p5 = scmp.lt.u32.totalorder %s3301_s11, %s3354_s3 }
 0x1f2   : > { %p2499_p11 = scmp.lt.u32.totalorder %s2497_s10, %s2493_s30  ;;  %p2501_p4 = scmp.lt.u32.totalorder %s2493_s30, %s3301_s11 }
 0x1f3   : > { %p2495_p1 = pnand %p2494_p9, %p2672_p12 }
 0x1f4   : > { %p2500_p2 = por %p2499_p11, %p2498_p5 }
 0x1f5   : > { %p2496_p0 = pneg %p2495_p1 }
 0x1f6   : > { %p2502_p6 = por %p2501_p4, %p2500_p2 }
 0x1f8   : > { %p2503_p8 = pnand %p2502_p6, %p2496_p0 }
 0x1fa   : > { %2506 = shalt.err (!%p2503_p8)
}
 0x1fb   : > { %s2556_s20 = smov 128   ;;  %s2557_s8 = smov 8  }
 0x1fc   : > { %2234 = dma.vmem_to_hbm [thread:$0]  (%p2672_p12), %s3303_s4, 8192, %s3301_s11, %s1853_s16, %s2556_s20, %s2556_s20, %s2557_s8  }
 0x1fd PF: > { %s1882_s9 = sand.u32 1, %s2537_s12   ;;  %p3403_p10 = scmp.ne.s32.totalorder %s3375_s19, 0 }
 0x1fe   : > { %p3404_p13 = scmp.ge.s32.totalorder %s2549_s15, 2  ;;  %s1883_s25 = scalar_lea.sflag [#allocation4], %s1882_s9 }
 0x200   : > { %p2245_p3 = pnand %p3404_p13, %p3403_p10 }
 0x202   : > { %2532 = dma.done.wait (!%p2245_p3), %s1883_s25, 8192  }
 0x203   : > { %2534 = vsyncadd (!%p2245_p3), %s1883_s25, 4294959104  ;;  %p17_p7 = scmp.ge.s32.totalorder %s2634_s24, 4   ;;  %s3405_s12 = smov %s2541_s13 }
 0x204   : > { %s3406_s13 = smov %s2545_s14  ;;  %s3407_s14 = smov %s2668_s17 }
 0x205   : > { %s3408_s15 = smov %s2634_s24  ;;  %19 = sbr.rel (!%p17_p7) target bundleno = 6 (0x6), region = 81 }
 0x20c   :  { %1888 = vsyncpa [#allocation3], 1 }
 0x20d   :  { %1890 = vsyncpa [#allocation3 + $0x1], 1 }
 0x20e   :  { %1891 = vsyncpa [#allocation6], 1 }
 0x20f   :  { %1892 = vsyncpa [#allocation4], 1 }
 0x210   :  { %1894 = vsyncpa [#allocation4 + $0x1], 1 }

</bundles_post_ra>
